<compile_context>
chip_gen: v6e
topology: v6e:2x2x1
jax: 0.10.0
libtpu: 0.0.40
codegen_flags: <defaults>
</compile_context>

<pallas_src>
import jax
import jax.numpy as jnp
from jax.experimental import pallas as pl
from jax.experimental.pallas import tpu as pltpu

BN_EPS = 1e-5
C_IN = 3
C1, C2, C3 = 64, 128, 1024


# ---------------------------------------------------------------------------
# Kernel: 3 x (1x1 conv as bf16 matmul) with folded BN, ReLU on the first two
# layers, running max over points in a VMEM scratch accumulator, layer-3
# affine applied once after the max.
# ---------------------------------------------------------------------------
def _pointnetfeat_kernel(x_ref, w1, s1, b1, w2, s2, b2, w3, s3, b3,
                         o_ref, acc_ref):
    n = pl.program_id(2)

    @pl.when(n == 0)
    def _():
        acc_ref[...] = jnp.full(acc_ref.shape, -jnp.inf, acc_ref.dtype)

    x = x_ref[0].astype(jnp.bfloat16)                               # (3, T)

    # Layer 1 (K=3): channels-on-sublanes matmul, then one small transpose so
    # the wide layers keep channels on the lane axis.
    h = jnp.dot(w1[...], x, preferred_element_type=jnp.float32)     # (64, T)
    h = h.T                                                         # (T, 64)
    h = jnp.maximum(h * s1[...] + b1[...], 0.0).astype(jnp.bfloat16)

    h = jnp.dot(h, w2[...], preferred_element_type=jnp.float32)     # (T, 128)
    h = jnp.maximum(h * s2[...] + b2[...], 0.0).astype(jnp.bfloat16)

    p = jnp.dot(h, w3[...], preferred_element_type=jnp.float32)     # (T, 1024)

    # Per-tile reduction into the (8, 1024) running-max accumulator.  The
    # (T//8, 8, 1024) reshape matches the native f32 sublane tiling, so this
    # reduction is pure elementwise (VPU) maxima; the 8->1 sublane reduce
    # happens only once per (split, batch) group below.
    t = p.shape[0]
    if t % 8 == 0:
        tile_red = jnp.max(p.reshape(t // 8, 8, C3), axis=0)        # (8, 1024)
    else:
        tile_red = jnp.broadcast_to(jnp.max(p, axis=0, keepdims=True), (8, C3))
    acc_ref[...] = jnp.maximum(acc_ref[...], tile_red)

    @pl.when(n == pl.num_programs(2) - 1)
    def _():
        m = jnp.max(acc_ref[...], axis=0, keepdims=True)            # (1, 1024)
        # Layer-3 BN/bias applied after the max (valid while every s3 > 0).
        o_ref[...] = (m * s3[...] + b3[...]).astype(o_ref.dtype).reshape(o_ref.shape)


# ---------------------------------------------------------------------------
# Wrapper
# ---------------------------------------------------------------------------
def pointnetfeat(x, params, *, tile_n=None, num_splits=None):
    """x: (B, 3, N) point cloud -> (B, 1024) global feature (eval-mode BN)."""
    B, C, N = x.shape
    assert C == C_IN

    if tile_n is None:
        if N <= 1024:
            tile_n = N
        else:
            # Keep the (tile_n, 1024) f32 layer-3 intermediate <= 4 MiB.
            tile_n = next((t for t in (1024, 512, 256, 128) if N % t == 0), None)
    # TODO(synk): ragged N (not tiling evenly) needs a padded tail with pad
    # rows masked to -inf before the max, instead of this assert.
    assert tile_n is not None and N % tile_n == 0, "N must tile evenly"
    n_tiles = N // tile_n

    if num_splits is None:
        # Split the point axis across a leading parallel grid axis so both v7x
        # TensorCores are busy even at B == 1 (harmless on single-TC chips).
        num_splits = 2 if (n_tiles % 2 == 0 and n_tiles >= 2) else 1
    assert n_tiles % num_splits == 0
    nt = n_tiles // num_splits

    def const_spec(a):
        # Grid-invariant operand: DMA'd once (block index never changes).
        # (pl.Buffered(1) would also drop the second VMEM buffer; default kept.)
        return pl.BlockSpec(a.shape, lambda s, b, n: (0,) * a.ndim)

    out = pl.pallas_call(
        _pointnetfeat_kernel,
        out_shape=jax.ShapeDtypeStruct((B, num_splits, 1, C3), jnp.float32),
        grid_spec=pltpu.PrefetchScalarGridSpec(
            num_scalar_prefetch=0,
            grid=(num_splits, B, nt),
            in_specs=[pl.BlockSpec((1, C_IN, tile_n),
                                   lambda s, b, n: (b, 0, s * nt + n))]
                     + [const_spec(a) for a in params],
            out_specs=pl.BlockSpec((1, 1, 1, C3), lambda s, b, n: (b, s, 0, 0)),
            scratch_shapes=[pltpu.VMEM((8, C3), jnp.float32)],
        ),
        compiler_params=pltpu.CompilerParams(
            dimension_semantics=("parallel", "parallel", "arbitrary"),
            vmem_limit_bytes=32 * 1024 * 1024),
    )(x, *params)

    # Merge per-split partial maxima (tiny XLA op; no-op when num_splits == 1).
    return jnp.max(out.reshape(B, num_splits, C3), axis=1)


# ---------------------------------------------------------------------------
# Deterministic parameter init (synthetic weights; BN folded in eval mode with
# PyTorch-default stats: gamma=1, beta=0, running_mean=0, running_var=1).
# ---------------------------------------------------------------------------
def init_params(key):
    ks = jax.random.split(key, 6)

    def dense(kw, kb, cin, cout):
        w = jax.random.normal(kw, (cin, cout), jnp.float32) / jnp.sqrt(float(cin))
        b = jax.random.normal(kb, (cout,), jnp.float32) * 0.05
        return w, b

    def fold_bn(bias, cout):
        gamma = jnp.ones((cout,), jnp.float32)
        beta = jnp.zeros((cout,), jnp.float32)
        mean = jnp.zeros((cout,), jnp.float32)
        var = jnp.ones((cout,), jnp.float32)
        scale = gamma / jnp.sqrt(var + BN_EPS)
        shift = (bias - mean) * scale + beta
        return scale.reshape(1, cout), shift.reshape(1, cout)

    w1, b1 = dense(ks[0], ks[1], C_IN, C1)     # (3, 64)
    w2, b2 = dense(ks[2], ks[3], C1, C2)       # (64, 128)
    w3, b3 = dense(ks[4], ks[5], C2, C3)       # (128, 1024)

    s1, h1 = fold_bn(b1, C1)
    s2, h2 = fold_bn(b2, C2)
    s3, h3 = fold_bn(b3, C3)

    # TODO(synk): load real checkpoint weights (convK.weight.squeeze(-1), BN
    # running stats) here; layouts below are checkpoint-compatible.  The
    # layer-3 affine-after-max hoist in the kernel requires every folded scale
    # s3 > 0 (true for default BN stats); guard when loading real gammas.
    w1_cf = w1.T.astype(jnp.bfloat16)          # (64, 3)    channels-first, layer 1
    w2_io = w2.astype(jnp.bfloat16)            # (64, 128)  (C_in, C_out)
    w3_io = w3.astype(jnp.bfloat16)            # (128, 1024)
    return (w1_cf, s1, h1, w2_io, s2, h2, w3_io, s3, h3)


# Pure-JAX reference (same folded-BN eval semantics, f32 math) for correctness.
def pointnetfeat_ref(x, params):
    w1, s1, b1, w2, s2, b2, w3, s3, b3 = params
    w1f = w1.astype(jnp.float32).T             # (3, 64)
    w2f = w2.astype(jnp.float32)
    w3f = w3.astype(jnp.float32)
    xt = jnp.transpose(x, (0, 2, 1))           # (B, N, 3)
    h = jnp.maximum(xt @ w1f * s1 + b1, 0.0)
    h = jnp.maximum(h @ w2f * s2 + b2, 0.0)
    h = h @ w3f * s3 + b3
    return jnp.max(h, axis=1)                  # (B, 1024)


if __name__ == "__main__":
    key = jax.random.PRNGKey(0)
    k_param, k_in1, k_in2 = jax.random.split(key, 3)

    params = init_params(k_param)

    # Small case: B=2, N=256 (single point tile per batch, no split).
    x = jax.random.uniform(k_in1, (2, C_IN, 256), jnp.float32)
    out = pointnetfeat(x, params)
    jax.block_until_ready(out)
    assert out.shape == (2, C3)
    assert bool(jnp.all(jnp.isfinite(out)))
    ref = pointnetfeat_ref(x, params)
    assert bool(jnp.allclose(out, ref, rtol=2e-2, atol=2e-2)), \
        float(jnp.max(jnp.abs(out - ref)))

    # Multi-tile + split-point-axis case: B=1, N=1024, tile_n=256
    # (grid = (2 splits, 1 batch, 2 point steps)).
    x2 = jax.random.uniform(k_in2, (1, C_IN, 1024), jnp.float32)
    out2 = pointnetfeat(x2, params, tile_n=256)
    jax.block_until_ready(out2)
    ref2 = pointnetfeat_ref(x2, params)
    assert out2.shape == (1, C3)
    assert bool(jnp.all(jnp.isfinite(out2)))
    assert bool(jnp.allclose(out2, ref2, rtol=2e-2, atol=2e-2)), \
        float(jnp.max(jnp.abs(out2 - ref2)))

    print("KERNEL_OK")
</pallas_src>

<mosaic_0001>
module attributes {stable_mosaic.version = 11 : i64} {
  func.func @_pointnetfeat_kernel(%arg0: i32, %arg1: i32, %arg2: i32, %arg3: memref<1x3x256xf32, #tpu.memory_space<vmem>>, %arg4: memref<64x3xbf16, #tpu.memory_space<vmem>>, %arg5: memref<1x64xf32, #tpu.memory_space<vmem>>, %arg6: memref<1x64xf32, #tpu.memory_space<vmem>>, %arg7: memref<64x128xbf16, #tpu.memory_space<vmem>>, %arg8: memref<1x128xf32, #tpu.memory_space<vmem>>, %arg9: memref<1x128xf32, #tpu.memory_space<vmem>>, %arg10: memref<128x1024xbf16, #tpu.memory_space<vmem>>, %arg11: memref<1x1024xf32, #tpu.memory_space<vmem>>, %arg12: memref<1x1024xf32, #tpu.memory_space<vmem>>, %arg13: memref<1x1x1x1024xf32, #tpu.memory_space<vmem>>, %arg14: memref<8x1024xf32, #tpu.memory_space<vmem>>) attributes {dimension_semantics = [#tpu.dimension_semantics<parallel>, #tpu.dimension_semantics<parallel>, #tpu.dimension_semantics<arbitrary>], iteration_bounds = array<i64: 1, 2, 1>, scalar_prefetch = 0 : i64, scratch_operands = 1 : i64, tpu.core_type = #tpu.core_type<tc>, window_params = [{transform_indices = @transform_0, window_bounds = array<i64: 1, 3, 256>}, {pipeline_mode = #tpu.pipeline_mode<synchronous>, transform_indices = @transform_1, window_bounds = array<i64: 64, 3>}, {pipeline_mode = #tpu.pipeline_mode<synchronous>, transform_indices = @transform_2, window_bounds = array<i64: 1, 64>}, {pipeline_mode = #tpu.pipeline_mode<synchronous>, transform_indices = @transform_3, window_bounds = array<i64: 1, 64>}, {pipeline_mode = #tpu.pipeline_mode<synchronous>, transform_indices = @transform_4, window_bounds = array<i64: 64, 128>}, {pipeline_mode = #tpu.pipeline_mode<synchronous>, transform_indices = @transform_5, window_bounds = array<i64: 1, 128>}, {pipeline_mode = #tpu.pipeline_mode<synchronous>, transform_indices = @transform_6, window_bounds = array<i64: 1, 128>}, {pipeline_mode = #tpu.pipeline_mode<synchronous>, transform_indices = @transform_7, window_bounds = array<i64: 128, 1024>}, {pipeline_mode = #tpu.pipeline_mode<synchronous>, transform_indices = @transform_8, window_bounds = array<i64: 1, 1024>}, {pipeline_mode = #tpu.pipeline_mode<synchronous>, transform_indices = @transform_9, window_bounds = array<i64: 1, 1024>}, {transform_indices = @transform_10, window_bounds = array<i64: 1, 1, 1, 1024>}]} {
    %c0_i32 = arith.constant 0 : i32
    %0 = arith.cmpi eq, %arg2, %c0_i32 : i32
    %1 = arith.extui %0 : i1 to i32
    %c0_i32_0 = arith.constant 0 : i32
    %2 = arith.cmpi ne, %1, %c0_i32_0 : i32
    scf.if %2 {
      %cst_28 = arith.constant 0xFF800000 : f32
      %39 = vector.broadcast %cst_28 : f32 to vector<8x1024xf32>
      %c0_29 = arith.constant 0 : index
      %c0_30 = arith.constant 0 : index
      %40 = vector.load %arg14[%c0_29, %c0_30] : memref<8x1024xf32, #tpu.memory_space<vmem>>, vector<8x1024xf32>
      tpu.vector_store %arg14[%c0_29, %c0_30], %39 {strides = array<i32>} : memref<8x1024xf32, #tpu.memory_space<vmem>>, vector<8x1024xf32>,
    } else {
    }
    %c0 = arith.constant 0 : index
    %c0_1 = arith.constant 0 : index
    %c0_2 = arith.constant 0 : index
    %3 = vector.load %arg3[%c0, %c0_1, %c0_2] : memref<1x3x256xf32, #tpu.memory_space<vmem>>, vector<1x3x256xf32>
    %4 = vector.shape_cast %3 : vector<1x3x256xf32> to vector<3x256xf32>
    %5 = arith.truncf %4 : vector<3x256xf32> to vector<3x256xbf16>
    %c0_3 = arith.constant 0 : index
    %c0_4 = arith.constant 0 : index
    %6 = vector.load %arg4[%c0_3, %c0_4] : memref<64x3xbf16, #tpu.memory_space<vmem>>, vector<64x3xbf16>
    %cst = arith.constant dense<0.000000e+00> : vector<64x256xf32>
    %7 = tpu.matmul %6, %5, %cst {dimension_numbers = #tpu.dot_dimension_numbers<[1], [0], [0], [1], [0, 0, 1, 1], [], []>} : vector<64x3xbf16>, vector<3x256xbf16>, vector<64x256xf32> -> vector<64x256xf32>
    %8 = tpu.transpose %7, [1, 0] : vector<64x256xf32> -> vector<256x64xf32>
    %c0_5 = arith.constant 0 : index
    %c0_6 = arith.constant 0 : index
    %9 = vector.load %arg5[%c0_5, %c0_6] : memref<1x64xf32, #tpu.memory_space<vmem>>, vector<1x64xf32>
    %10 = vector.broadcast %9 : vector<1x64xf32> to vector<256x64xf32>
    %11 = arith.mulf %8, %10 : vector<256x64xf32>
    %c0_7 = arith.constant 0 : index
    %c0_8 = arith.constant 0 : index
    %12 = vector.load %arg6[%c0_7, %c0_8] : memref<1x64xf32, #tpu.memory_space<vmem>>, vector<1x64xf32>
    %13 = vector.broadcast %12 : vector<1x64xf32> to vector<256x64xf32>
    %14 = arith.addf %11, %13 : vector<256x64xf32>
    %cst_9 = arith.constant 0.000000e+00 : f32
    %15 = vector.broadcast %cst_9 : f32 to vector<256x64xf32>
    %16 = arith.maximumf %14, %15 : vector<256x64xf32>
    %17 = arith.truncf %16 : vector<256x64xf32> to vector<256x64xbf16>
    %c0_10 = arith.constant 0 : index
    %c0_11 = arith.constant 0 : index
    %18 = vector.load %arg7[%c0_10, %c0_11] : memref<64x128xbf16, #tpu.memory_space<vmem>>, vector<64x128xbf16>
    %cst_12 = arith.constant dense<0.000000e+00> : vector<256x128xf32>
    %19 = tpu.matmul %17, %18, %cst_12 {dimension_numbers = #tpu.dot_dimension_numbers<[1], [0], [0], [1], [0, 0, 1, 1], [], []>} : vector<256x64xbf16>, vector<64x128xbf16>, vector<256x128xf32> -> vector<256x128xf32>
    %c0_13 = arith.constant 0 : index
    %c0_14 = arith.constant 0 : index
    %20 = vector.load %arg8[%c0_13, %c0_14] : memref<1x128xf32, #tpu.memory_space<vmem>>, vector<1x128xf32>
    %21 = vector.broadcast %20 : vector<1x128xf32> to vector<256x128xf32>
    %22 = arith.mulf %19, %21 : vector<256x128xf32>
    %c0_15 = arith.constant 0 : index
    %c0_16 = arith.constant 0 : index
    %23 = vector.load %arg9[%c0_15, %c0_16] : memref<1x128xf32, #tpu.memory_space<vmem>>, vector<1x128xf32>
    %24 = vector.broadcast %23 : vector<1x128xf32> to vector<256x128xf32>
    %25 = arith.addf %22, %24 : vector<256x128xf32>
    %cst_17 = arith.constant 0.000000e+00 : f32
    %26 = vector.broadcast %cst_17 : f32 to vector<256x128xf32>
    %27 = arith.maximumf %25, %26 : vector<256x128xf32>
    %28 = arith.truncf %27 : vector<256x128xf32> to vector<256x128xbf16>
    %c0_18 = arith.constant 0 : index
    %c0_19 = arith.constant 0 : index
    %29 = vector.load %arg10[%c0_18, %c0_19] : memref<128x1024xbf16, #tpu.memory_space<vmem>>, vector<128x1024xbf16>
    %cst_20 = arith.constant dense<0.000000e+00> : vector<256x1024xf32>
    %30 = tpu.matmul %28, %29, %cst_20 {dimension_numbers = #tpu.dot_dimension_numbers<[1], [0], [0], [1], [0, 0, 1, 1], [], []>} : vector<256x128xbf16>, vector<128x1024xbf16>, vector<256x1024xf32> -> vector<256x1024xf32>
    %31 = vector.shape_cast %30 : vector<256x1024xf32> to vector<32x8x1024xf32>
    %cst_21 = arith.constant dense<0xFF800000> : vector<8x1024xf32>
    %32 = vector.multi_reduction <maximumf>, %31, %cst_21 [0] : vector<32x8x1024xf32> to vector<8x1024xf32>
    %c0_22 = arith.constant 0 : index
    %c0_23 = arith.constant 0 : index
    %33 = vector.load %arg14[%c0_22, %c0_23] : memref<8x1024xf32, #tpu.memory_space<vmem>>, vector<8x1024xf32>
    %34 = arith.maximumf %33, %32 : vector<8x1024xf32>
    %c0_24 = arith.constant 0 : index
    %c0_25 = arith.constant 0 : index
    %35 = vector.load %arg14[%c0_24, %c0_25] : memref<8x1024xf32, #tpu.memory_space<vmem>>, vector<8x1024xf32>
    tpu.vector_store %arg14[%c0_24, %c0_25], %34 {strides = array<i32>} : memref<8x1024xf32, #tpu.memory_space<vmem>>, vector<8x1024xf32>,
    %c0_i32_26 = arith.constant 0 : i32
    %36 = arith.cmpi eq, %arg2, %c0_i32_26 : i32
    %37 = arith.extui %36 : i1 to i32
    %c0_i32_27 = arith.constant 0 : i32
    %38 = arith.cmpi ne, %37, %c0_i32_27 : i32
    scf.if %38 {
      %c0_28 = arith.constant 0 : index
      %c0_29 = arith.constant 0 : index
      %39 = vector.load %arg14[%c0_28, %c0_29] : memref<8x1024xf32, #tpu.memory_space<vmem>>, vector<8x1024xf32>
      %cst_30 = arith.constant dense<0xFF800000> : vector<1024xf32>
      %40 = vector.multi_reduction <maximumf>, %39, %cst_30 [0] : vector<8x1024xf32> to vector<1024xf32>
      %41 = vector.shape_cast %40 : vector<1024xf32> to vector<1x1024xf32>
      %c0_31 = arith.constant 0 : index
      %c0_32 = arith.constant 0 : index
      %42 = vector.load %arg11[%c0_31, %c0_32] : memref<1x1024xf32, #tpu.memory_space<vmem>>, vector<1x1024xf32>
      %43 = arith.mulf %41, %42 : vector<1x1024xf32>
      %c0_33 = arith.constant 0 : index
      %c0_34 = arith.constant 0 : index
      %44 = vector.load %arg12[%c0_33, %c0_34] : memref<1x1024xf32, #tpu.memory_space<vmem>>, vector<1x1024xf32>
      %45 = arith.addf %43, %44 : vector<1x1024xf32>
      %46 = vector.shape_cast %45 : vector<1x1024xf32> to vector<1x1x1x1024xf32>
      %c0_35 = arith.constant 0 : index
      %c0_36 = arith.constant 0 : index
      %c0_37 = arith.constant 0 : index
      %c0_38 = arith.constant 0 : index
      %47 = vector.load %arg13[%c0_35, %c0_36, %c0_37, %c0_38] : memref<1x1x1x1024xf32, #tpu.memory_space<vmem>>, vector<1x1x1x1024xf32>
      tpu.vector_store %arg13[%c0_35, %c0_36, %c0_37, %c0_38], %46 {strides = array<i32>} : memref<1x1x1x1024xf32, #tpu.memory_space<vmem>>, vector<1x1x1x1024xf32>,
    } else {
    }
    return
  }
  func.func @transform_0(%arg0: i32, %arg1: i32, %arg2: i32) -> (i32, i32, i32) {
    %c1_i32 = arith.constant 1 : i32
    %0 = arith.muli %arg0, %c1_i32 : i32
    %1 = arith.addi %0, %arg2 : i32
    %c0_i32 = arith.constant 0 : i32
    %c0_i32_0 = arith.constant 0 : i32
    return %arg1, %c0_i32, %1 : i32, i32, i32
  }
  func.func @transform_1(%arg0: i32, %arg1: i32, %arg2: i32) -> (i32, i32) {
    %c0_i32 = arith.constant 0 : i32
    %c0_i32_0 = arith.constant 0 : i32
    %c0_i32_1 = arith.constant 0 : i32
    return %c0_i32, %c0_i32_0 : i32, i32
  }
  func.func @transform_2(%arg0: i32, %arg1: i32, %arg2: i32) -> (i32, i32) {
    %c0_i32 = arith.constant 0 : i32
    %c0_i32_0 = arith.constant 0 : i32
    %c0_i32_1 = arith.constant 0 : i32
    return %c0_i32, %c0_i32_0 : i32, i32
  }
  func.func @transform_3(%arg0: i32, %arg1: i32, %arg2: i32) -> (i32, i32) {
    %c0_i32 = arith.constant 0 : i32
    %c0_i32_0 = arith.constant 0 : i32
    %c0_i32_1 = arith.constant 0 : i32
    return %c0_i32, %c0_i32_0 : i32, i32
  }
  func.func @transform_4(%arg0: i32, %arg1: i32, %arg2: i32) -> (i32, i32) {
    %c0_i32 = arith.constant 0 : i32
    %c0_i32_0 = arith.constant 0 : i32
    %c0_i32_1 = arith.constant 0 : i32
    return %c0_i32, %c0_i32_0 : i32, i32
  }
  func.func @transform_5(%arg0: i32, %arg1: i32, %arg2: i32) -> (i32, i32) {
    %c0_i32 = arith.constant 0 : i32
    %c0_i32_0 = arith.constant 0 : i32
    %c0_i32_1 = arith.constant 0 : i32
    return %c0_i32, %c0_i32_0 : i32, i32
  }
  func.func @transform_6(%arg0: i32, %arg1: i32, %arg2: i32) -> (i32, i32) {
    %c0_i32 = arith.constant 0 : i32
    %c0_i32_0 = arith.constant 0 : i32
    %c0_i32_1 = arith.constant 0 : i32
    return %c0_i32, %c0_i32_0 : i32, i32
  }
  func.func @transform_7(%arg0: i32, %arg1: i32, %arg2: i32) -> (i32, i32) {
    %c0_i32 = arith.constant 0 : i32
    %c0_i32_0 = arith.constant 0 : i32
    %c0_i32_1 = arith.constant 0 : i32
    return %c0_i32, %c0_i32_0 : i32, i32
  }
  func.func @transform_8(%arg0: i32, %arg1: i32, %arg2: i32) -> (i32, i32) {
    %c0_i32 = arith.constant 0 : i32
    %c0_i32_0 = arith.constant 0 : i32
    %c0_i32_1 = arith.constant 0 : i32
    return %c0_i32, %c0_i32_0 : i32, i32
  }
  func.func @transform_9(%arg0: i32, %arg1: i32, %arg2: i32) -> (i32, i32) {
    %c0_i32 = arith.constant 0 : i32
    %c0_i32_0 = arith.constant 0 : i32
    %c0_i32_1 = arith.constant 0 : i32
    return %c0_i32, %c0_i32_0 : i32, i32
  }
  func.func @transform_10(%arg0: i32, %arg1: i32, %arg2: i32) -> (i32, i32, i32, i32) {
    %c0_i32 = arith.constant 0 : i32
    %c0_i32_0 = arith.constant 0 : i32
    %c0_i32_1 = arith.constant 0 : i32
    return %arg1, %arg0, %c0_i32, %c0_i32_0 : i32, i32, i32, i32
  }
}

</mosaic_0001>

<bundles_post_ra>
// kernel: tpu_custom_call.1
= control target key start
LH: loop header
LB: loop body
LE: loop exit
PB: predicated region body
PF: predicated region fallthrough
CT: control target
= control target key end

     0   :  { %s4078_s0 = inlined_call_operand.vmem [shape: f32[2,3,256], index: 0, kind: input, shape index: {}]   ;;  %s4079_s1 = inlined_call_operand.vmem [shape: bf16[64,3], index: 1, kind: input, shape index: {}]   ;;  %s4080_s2 = inlined_call_operand.vmem [shape: f32[1,64], index: 2, kind: input, shape index: {}]   ;;  %s4081_s3 = inlined_call_operand.vmem [shape: f32[1,64], index: 3, kind: input, shape index: {}]   ;;  %s4082_s4 = inlined_call_operand.vmem [shape: bf16[64,128], index: 4, kind: input, shape index: {}]   ;;  %s4083_s5 = inlined_call_operand.vmem [shape: f32[1,128], index: 5, kind: input, shape index: {}]   ;;  %s4084_s6 = inlined_call_operand.vmem [shape: f32[1,128], index: 6, kind: input, shape index: {}]   ;;  %s4085_s7 = inlined_call_operand.hbm [shape: bf16[128,1024], index: 7, kind: input, shape index: {}]   ;;  %s4086_s8 = inlined_call_operand.vmem [shape: f32[1,1024], index: 8, kind: input, shape index: {}]   ;;  %s4087_s9 = inlined_call_operand.vmem [shape: f32[1,1024], index: 9, kind: input, shape index: {}]   ;;  %s4088_s10 = inlined_call_operand.hbm [shape: f32[2,1,1,1024], index: 10, kind: output, shape index: {}]  }
   0x1   :  { %4099 = sst [smem:[#allocation31_spill]] %s4078_s0 }
   0x2   :  { %4100 = sst [smem:[#allocation32_spill]] %s4079_s1 }
   0x3   :  { %15 = vsyncpa [#allocation4], 0 }
   0x4   :  { %16 = vsyncpa [#allocation5], 0 }
   0x5   :  { %18 = vsyncpa [#allocation5 + $0x1], 0  ;;  %s3312_s13 = smov 0   ;;  %s3314_s14 = smov 0  }
   0x6   :  { %s3316_s15 = smov 0   ;;  %s3318_s16 = smov 0  }
   0x7   :  { %s3320_s17 = smov 0   ;;  %s3322_s18 = smov 0  }
   0x8 LB: > { %s2872_s19 = sadd.s32 4294967295, %s3248_s18   ;;  %s2873_s20 = sadd.s32 4294967294, %s3248_s18   ;;  %s3248_s18 = sphi %s3322_s18, %s24_s18   ;;  %s3244_s17 = sphi %s3320_s17, %s4156_s17   ;;  %s3240_s16 = sphi %s3318_s16, %s4155_s16   ;;  %s3236_s15 = sphi %s3316_s15, %s4154_s15   ;;  %s3232_s14 = sphi %s3314_s14, %s4153_s14   ;;  %s3228_s13 = sphi %s3312_s13, %s4152_s13  }
   0x9   : > { %s39_s21 = sadd.s32 1, %s3244_s17  ;;  %s271_s22 = sadd.s32 1, %s3236_s15 }
   0xa   : > { %p41_p0 = scmp.ge.s32.totalorder %s39_s21, 2  ;;  %p281_p1 = scmp.ne.s32.totalorder %s3236_s15, %s3232_s14 }
   0xb   : > { %p282_p2 = scmp.eq.s32.totalorder %s2872_s19, 1  ;;  %p287_p3 = scmp.ne.s32.totalorder %s3232_s14, %s3228_s13 }
   0xc   : > { %s4158_s21 = smov (%p41_p0, %s39_s21), 0  ;;  %p288_p5 = scmp.eq.s32.totalorder %s2873_s20, 1 }
   0xd   : > { %p3352_p4 = por %p282_p2, %p281_p1  ;;  %s266_s24 = ssub.s32 %s3244_s17, %s4158_s21 }
   0xe   : > { %p2874_p6 = scmp.ge.s32.totalorder %s3248_s18, 1  ;;  %p269_p7 = scmp.eq.s32.totalorder %s266_s24, 0 }
   0xf   : > { %p3359_p8 = por %p288_p5, %p287_p3  ;;  %p295_p9 = scmp.lt.s32.totalorder %s3248_s18, 3 }
  0x10   : > { %s3365_s26 = scalar_select %p269_p7, %s3236_s15, %s271_s22  }
  0x11   : > { %p3367_p10 = pnand %p2874_p6, %p295_p9  ;;  %p3371_p11 = scmp.eq.s32.totalorder %s2872_s19, 0 }
  0x12   : > { %s3250_s29 = smov [#allocation3]  }
  0x13   : > { %p3067_p12 = pneg %p3367_p10  ;;  %s325_s30 = sshll.u32 %s3250_s29, 4  ;;  %s326_s30 = int_to_ptr.vmem [resolvable:$true] %s325_s30 }
  0x14   : > { %s3153_s11 = scalar_lea.vmem %s326_s30, 8192  ;;  %p3161_p5 = scmp.lt.s32.totalorder %s326_s30, %s326_s30 }
  0x15   : > { %p3068_p13 = pnand %p3371_p11, %p3067_p12  ;;  %p3154_p1 = scmp.ne.s32.totalorder %s326_s30, %s3153_s11 }
  0x16   : > { %p3162_p6 = scmp.lt.s32.totalorder %s3153_s11, %s3153_s11 }
  0x17   : > { %p3144_p0 = pneg %p3068_p13 }
  0x18   : > { %p3163_p7 = por %p3162_p6, %p3161_p5 }
  0x19   : > { %p3156_p2 = pnand %p3154_p1, %p3144_p0 }
  0x1b   : > { %p3157_p3 = pneg %p3156_p2 }
  0x1d   : > { %p3164_p9 = pnand %p3163_p7, %p3157_p3 }
  0x1f   : > { %3167 = shalt.err (!%p3164_p9)
}
  0x20   : > { %s3251_s12 = smov 512   ;;  %s3252_s19 = smov 32  }
  0x21   : > { %3070 = dma.hbm_to_vmem [thread:$0]  (!%p3068_p13), %s4085_s7, 8192, %s326_s30, [#allocation4], %s3251_s12, %s3251_s12, %s3252_s19  }
  0x22   : > { %362 = sbr.rel (%p3367_p10) target bundleno = 1109 (0x455), region = 60 }
  0x27   : > { %3219 = dma.done.wait (%p3371_p11), [#allocation4], 8192  }
  0x28   : > { %3221 = vsyncadd (%p3371_p11), [#allocation4], 4294959104  ;;  %p407_p12 = scmp.lt.s32.totalorder %s3240_s16, 1  ;;  %vm477_vm0 = vcmask 1040384   ;;  %v3253_v0 = vmov 0   ;;  %s4105_s0 = sld [smem:[#allocation31_spill]] }
  0x29   : > { %519 = vmatprep.mubr.bf16.mxu0 %v3253_v0  ;;  %vm478_vm1 = vcmask 1041408   ;;  %v3254_v1 = vmov 65535   ;;  %s4106_s1 = sld [smem:[#allocation32_spill]]  ;;  %vm464_vm2 = vcmask 23552   ;;  %v3138_v15 = vld [vmem:[%s4082_s4 + $0x18] sm:$0xff]   ;;  %v3139_v18 = vld [vmem:[%s4082_s4 + $0x10] sm:$0xff]  }
  0x2a   : > { %s408_s24 = scalar_select %p407_p12, %s3240_s16, 1  ;;  %v479_v2 = vsel %vm477_vm0, 4294967295, %v3254_v1  ;;  %3005 = vmatprep.subr.bf16.mxu1 %v3138_v15  ;;  %v3140_v21 = vld [vmem:[%s4082_s4 + $0x8] sm:$0xff]   ;;  %v3141_v24 = vld [vmem:[%s4082_s4] sm:$0xff]   ;;  %vm782_vm3 = vcmask 523264  }
  0x2b   : > { %v480_v5 = vsel %vm478_vm1, %v479_v2, 0  ;;  %3006 = vmatpush3.bf16.msra.mxu1 %v3138_v15  ;;  %v1174_v34 = vld [vmem:[#allocation3 + $0x1c0] sm:$0xff]  ;;  %v3422_v36 = vld [vmem:[#allocation3 + $0x1c8] sm:$0xff]  ;;  %s402_s30 = sand.u32 1, %s3232_s14   ;;  %s2984_s28 = sshll.u32 %s3240_s16, 7 }
  0x2c   : > { %s2983_s29 = sshll.u32 %s408_s24, 3  ;;  %3007 = vmatprep.subr.bf16.mxu1 %v3139_v18  ;;  %v1178_v35 = vld [vmem:[#allocation3 + $0x1e0] sm:$0xff]  ;;  %v3424_v39 = vld [vmem:[#allocation3 + $0x1e8] sm:$0xff]  ;;  %s2779_s24 = scalar_lea.hbm %s4088_s10, %s2984_s28 }
  0x2d   : > { %v2970_v37 = vcombine.low %v1174_v34, %v1178_v35  ;;  %v2971_v38 = vcombine.high %v1174_v34, %v1178_v35  ;;  %v1166_v40 = vld [vmem:[#allocation3 + $0x180] sm:$0xff]  ;;  %v2973_v42 = vcombine.high %v3422_v36, %v3424_v39  ;;  %v1159_v34 = vld [vmem:[#allocation3 + $0x148] sm:$0xff]  ;;  %s3256_s16 = smov [#allocation6]  }
  0x2e   : > { %s414_s27 = scalar_lea.vmem %s4105_s0, %s2983_s29  ;;  %v1170_v41 = vld [vmem:[#allocation3 + $0x1a0] sm:$0xff]  ;;  %v1163_v35 = vld [vmem:[#allocation3 + $0x168] sm:$0xff]  ;;  %s2765_s29 = scalar_lea.sflag [#allocation5], %s402_s30 }
  0x2f   : > { %v430_v3 = vld [vmem:[%s414_s27] sm:$0x77]  ;;  %v3135_v11 = vld [vmem:[%s4106_s1 + $0x8] sm:$0xff]   ;;  %v3136_v12 = vld [vmem:[%s4106_s1 + $0x10] sm:$0xff]   ;;  %3008 = vmatpush3.bf16.msra.mxu1 %v3139_v18  ;;  %v2963_v43 = vcombine.high %v1166_v40, %v1170_v41  ;;  %v2962_v46 = vcombine.low %v1166_v40, %v1170_v41  ;;  %s2879_s27 = sshll.u32 %s402_s30, 3 }
  0x30   : > { %v432_v4 = vcombine.high %v430_v3, %v430_v3  ;;  %v434_v6 = vpack.c.bf16 %v430_v3, %v430_v3  ;;  %v3134_v10 = vld [vmem:[%s4106_s1] sm:$0xff]   ;;  %v3137_v13 = vld [vmem:[%s4106_s1 + $0x18] sm:$0xff]   ;;  %3009 = vmatprep.subr.bf16.mxu1 %v3140_v21  ;;  %s404_s12 = scalar_lea.vmem [#allocation6], %s2879_s27  ;;  %s3172_s27 = sshll.u32 %s3256_s16, 4  ;;  %s3173_s27 = int_to_ptr.vmem [resolvable:$false] %s3172_s27 }
  0x31   : > { %v1158_v44 = vld [vmem:[#allocation3 + $0x140] sm:$0xff]  ;;  %s2781_s19 = sshll.u32 %s404_s12, 4  ;;  %s3174_s0 = scalar_lea.vmem %s3173_s27, 256  ;;  %s2782_s19 = int_to_ptr.vmem [resolvable:$true] %s2781_s19 }
  0x32   : > { %v435_v7 = vpack.c.bf16 %v432_v4, %v432_v4  ;;  %v482_v8 = vand.u32 %v480_v5, %v434_v6  ;;  %v1162_v45 = vld [vmem:[#allocation3 + $0x160] sm:$0xff]  ;;  %s3168_s11 = scalar_lea.vmem %s2782_s19, 128  ;;  %p3175_p0 = scmp.lt.s32.totalorder %s2782_s19, %s3173_s27 }
  0x33   : > { %3010 = vmatpush3.bf16.msra.mxu1 %v3140_v21  ;;  %v2955_v47 = vcombine.high %v1158_v44, %v1162_v45  ;;  %v1150_v48 = vld [vmem:[#allocation3 + $0x100] sm:$0xff]  ;;  %v2954_v50 = vcombine.low %v1158_v44, %v1162_v45  ;;  %v1171_v21 = vld [vmem:[#allocation3 + $0x1a8] sm:$0xff]  ;;  %p3169_p10 = scmp.ne.s32.totalorder %s2782_s19, %s3168_s11  ;;  %p3176_p1 = scmp.lt.s32.totalorder %s3174_s0, %s3168_s11 }
  0x34   : > { %v485_v9 = vand.u32 %v480_v5, %v435_v7  ;;  %3011 = vmatprep.subr.bf16.mxu1 %v3141_v24  ;;  %v1154_v49 = vld [vmem:[#allocation3 + $0x120] sm:$0xff] }
  0x35   : > { %v2947_v51 = vcombine.high %v1150_v48, %v1154_v49  ;;  %v1142_v52 = vld [vmem:[#allocation3 + $0xc0] sm:$0xff]  ;;  %v2946_v54 = vcombine.low %v1150_v48, %v1154_v49  ;;  %p3170_p11 = pnand %p3169_p10, %p3352_p4  ;;  %p3177_p2 = por %p3176_p1, %p3175_p0 }
  0x36   : > { %501 = vmatprep.subr.bf16.mxu0 %v485_v9  ;;  %v1146_v53 = vld [vmem:[#allocation3 + $0xe0] sm:$0xff] }
  0x37   : > { %502 = vmatpush1.bf16.msra.mxu0 %v482_v8  ;;  %3012 = vmatpush3.bf16.msra.mxu1 %v3141_v24  ;;  %v2939_v55 = vcombine.high %v1142_v52, %v1146_v53  ;;  %v2938_v56 = vcombine.low %v1142_v52, %v1146_v53  ;;  %v3431_v57 = vld [vmem:[%s4080_s2] ss:$0 sm:$0xff]  ;;  %v2956_v53 = vcombine.low %v1159_v34, %v1163_v35  ;;  %p3171_p13 = pneg %p3170_p11 }
  0x38   : > { %1502 = vmatprep.subr.bf16.mxu0 %v2971_v38  ;;  %1695 = vmatprep.subr.bf16.mxu1 %v2973_v42  ;;  %v3437_v60 = vld [vmem:[%s4081_s3] ss:$0 sm:$0xff] }
  0x39   : > { %p3178_p3 = pnand %p3177_p2, %p3171_p13 }
  0x3a   : > { %2886 = vmatmul.mubr.msk.bf16.vlgmr.msra.gmra.mxu0 %vm464_vm2, %v3134_v10 }
  0x3b   : > { %529 = vmatprep.mubr.bf16.mxu0 %v3253_v0  ;;  %1503 = vmatpush1.bf16.msra.mxu0 %v2970_v37 }
  0x3c   : > { %1504 = vmatprep.subr.bf16.mxu0 %v2963_v43  ;;  %v2957_v43 = vcombine.high %v1159_v34, %v1163_v35 }
  0x3f   : > { %1505 = vmatpush1.bf16.msra.mxu0 %v2962_v46  ;;  %v1151_v46 = vld [vmem:[#allocation3 + $0x108] sm:$0xff] }
  0x40   : > { %1506 = vmatprep.subr.bf16.mxu0 %v2955_v47  ;;  %v1155_v47 = vld [vmem:[#allocation3 + $0x128] sm:$0xff] }
  0x42   : > { %2887 = vmatmul.mubr.msk.bf16.gmra.mxu0 %vm464_vm2, %v3135_v11 }
  0x43   : > { %539 = vmatprep.mubr.bf16.mxu0 %v3253_v0  ;;  %1507 = vmatpush1.bf16.msra.mxu0 %v2954_v50 }
  0x44   : > { %1508 = vmatprep.subr.bf16.mxu0 %v2947_v51 }
  0x47   : > { %1509 = vmatpush1.bf16.msra.mxu0 %v2946_v54 }
  0x48   : > { %1510 = vmatprep.subr.bf16.mxu0 %v2939_v55 }
  0x4a   : > { %2888 = vmatmul.mubr.msk.bf16.gmra.mxu0 %vm464_vm2, %v3136_v12 }
  0x4b   : > { %549 = vmatprep.mubr.bf16.mxu0 %v3253_v0  ;;  %1511 = vmatpush1.bf16.msra.mxu0 %v2938_v56 }
  0x52   : > { %2889 = vmatmul.mubr.msk.bf16.gmra.mxu0 %vm464_vm2, %v3137_v13 }
  0x53   : > { %1534 = vmatprep.mubr.bf16.mxu0 %v3253_v0 }
  0xfa   : > { %v521_v14 = vpop.f32.mrf.mxu0 }
  0xfb   : > { %560 = vxpose.xlu0.b32.start [1/8] (short) %v521_v14, 128 }
  0xfc   : > { %v523_v16 = vpop.f32.mrf.mxu0 }
  0xfd   : > { %592 = vxpose.xlu1.b32.start [1/8] (short) %v523_v16, 128 }
  0xfe   : > { %v525_v17 = vpop.f32.mrf.mxu0 }
  0xff   : > { %561 = vxpose.xlu0.b32.cont [2/8] (short) %v525_v17, 128 }
 0x100   : > { %v527_v19 = vpop.f32.mrf.mxu0 }
 0x101   : > { %593 = vxpose.xlu1.b32.cont [2/8] (short) %v527_v19, 128 }
 0x102   : > { %v531_v20 = vpop.f32.mrf.mxu0 }
 0x103   : > { %562 = vxpose.xlu0.b32.cont [3/8] (short) %v531_v20, 128  ;;  %v1167_v20 = vld [vmem:[#allocation3 + $0x188] sm:$0xff] }
 0x104   : > { %v533_v22 = vpop.f32.mrf.mxu0 }
 0x105   : > { %594 = vxpose.xlu1.b32.cont [3/8] (short) %v533_v22, 128 }
 0x106   : > { %v535_v23 = vpop.f32.mrf.mxu0 }
 0x107   : > { %563 = vxpose.xlu0.b32.cont [4/8] (short) %v535_v23, 128 }
 0x108   : > { %v537_v25 = vpop.f32.mrf.mxu0 }
 0x109   : > { %595 = vxpose.xlu1.b32.cont [4/8] (short) %v537_v25, 128 }
 0x10a   : > { %v541_v26 = vpop.f32.mrf.mxu0 }
 0x10b   : > { %564 = vxpose.xlu0.b32.cont [5/8] (short) %v541_v26, 128 }
 0x10c   : > { %v543_v27 = vpop.f32.mrf.mxu0 }
 0x10d   : > { %596 = vxpose.xlu1.b32.cont [5/8] (short) %v543_v27, 128  ;;  %v2972_v27 = vcombine.low %v3422_v36, %v3424_v39  ;;  %v2964_v36 = vcombine.low %v1167_v20, %v1171_v21 }
 0x10e   : > { %v545_v28 = vpop.f32.mrf.mxu0 }
 0x10f   : > { %565 = vxpose.xlu0.b32.cont [6/8] (short) %v545_v28, 128 }
 0x110   : > { %v547_v29 = vpop.f32.mrf.mxu0 }
 0x111   : > { %597 = vxpose.xlu1.b32.cont [6/8] (short) %v547_v29, 128 }
 0x112   : > { %v551_v30 = vpop.f32.mrf.mxu0 }
 0x113   : > { %566 = vxpose.xlu0.b32.cont [7/8] (short) %v551_v30, 128 }
 0x114   : > { %v553_v31 = vpop.f32.mrf.mxu0 }
 0x115   : > { %598 = vxpose.xlu1.b32.cont [7/8] (short) %v553_v31, 128  ;;  %v2965_v31 = vcombine.high %v1167_v20, %v1171_v21 }
 0x116   : > { %v555_v32 = vpop.f32.mrf.mxu0 }
 0x117   : > { %567 = vxpose.xlu0.b32.end [8/8] (short) %v555_v32, 128 }
 0x118   : > { %v557_v33 = vpop.f32.mrf.mxu0 }
 0x119   : > { %599 = vxpose.xlu1.b32.end [8/8] (short) %v557_v33, 128 }
 0x177   : > { %v576_v58 = vpop.trf.xlu0 }
 0x178   : > { %v631_v59 = vmul.f32 %v3431_v57, %v576_v58  ;;  %v2949_v58 = vcombine.high %v1151_v46, %v1155_v47 }
 0x179   : > { %v3439_v61 = vpop.trf.xlu1 }
 0x17a   : > { %v670_v63 = vadd.f32 %v3437_v60, %v631_v59 }
 0x17b   : > { %v577_v62 = vpop.trf.xlu0 }
 0x17c   : > { %v632_v1 = vmul.f32 %v3431_v57, %v577_v62  ;;  %v702_v5 = vmax.f32 %v670_v63, 0.0  ;;  %v1143_v63 = vld [vmem:[#allocation3 + $0xc8] sm:$0xff] }
 0x17d   : > { %v3443_v2 = vpop.trf.xlu1 }
 0x17e   : > { %v671_v3 = vadd.f32 %v3437_v60, %v632_v1  ;;  %v1147_v1 = vld [vmem:[#allocation3 + $0xe8] sm:$0xff] }
 0x17f   : > { %v578_v4 = vpop.trf.xlu0 }
 0x180   : > { %v703_v6 = vmax.f32 %v671_v3, 0.0  ;;  %v633_v7 = vmul.f32 %v3431_v57, %v578_v4 }
 0x181   : > { %v610_v8 = vpop.trf.xlu1 }
 0x182   : > { %v734_v9 = vpack.c.bf16 %v703_v6, %v702_v5  ;;  %v649_v10 = vmul.f32 %v3431_v57, %v610_v8  ;;  %v672_v11 = vadd.f32 %v3437_v60, %v633_v7  ;;  %v2948_v7 = vcombine.low %v1151_v46, %v1155_v47 }
 0x183   : > { %v579_v12 = vpop.trf.xlu0 }
 0x184   : > { %v634_v13 = vmul.f32 %v3431_v57, %v579_v12  ;;  %3013 = vmatprep.mubr.msk.bf16.mxu1 %vm782_vm3, %v734_v9  ;;  %v688_v14 = vadd.f32 %v3437_v60, %v649_v10  ;;  %v704_v18 = vmax.f32 %v672_v11, 0.0  ;;  %v2941_v10 = vcombine.high %v1143_v63, %v1147_v1 }
 0x185   : > { %v611_v15 = vpop.trf.xlu1 }
 0x186   : > { %v673_v16 = vadd.f32 %v3437_v60, %v634_v13  ;;  %v650_v17 = vmul.f32 %v3431_v57, %v611_v15  ;;  %v720_v24 = vmax.f32 %v688_v14, 0.0 }
 0x187   : > { %v580_v19 = vpop.trf.xlu0 }
 0x188   : > { %v705_v22 = vmax.f32 %v673_v16, 0.0  ;;  %v635_v23 = vmul.f32 %v3431_v57, %v580_v19  ;;  %v689_v25 = vadd.f32 %v3437_v60, %v650_v17 }
 0x189   : > { %v612_v26 = vpop.trf.xlu1 }
 0x18a   : > { %v735_v28 = vpack.c.bf16 %v705_v22, %v704_v18  ;;  %v721_v29 = vmax.f32 %v689_v25, 0.0  ;;  %v651_v30 = vmul.f32 %v3431_v57, %v612_v26  ;;  %v674_v32 = vadd.f32 %v3437_v60, %v635_v23 }
 0x18b   : > { %v581_v33 = vpop.trf.xlu0  ;;  %v2940_v18 = vcombine.low %v1143_v63, %v1147_v1 }
 0x18c   : > { %v636_v37 = vmul.f32 %v3431_v57, %v581_v33  ;;  %3014 = vmatmul.mubr.msk.bf16.vlgmr.msra.gmra.mxu1 %vm782_vm3, %v735_v28  ;;  %v3462_v38 = vpack.c.bf16 %v721_v29, %v720_v24  ;;  %v690_v40 = vadd.f32 %v3437_v60, %v651_v30  ;;  %v706_v44 = vmax.f32 %v674_v32, 0.0 }
 0x18d   : > { %v613_v41 = vpop.trf.xlu1  ;;  %1696 = vmatpush1.bf16.msra.mxu1 %v2972_v27 }
 0x18e   : > { %v675_v39 = vadd.f32 %v3437_v60, %v636_v37  ;;  %v652_v42 = vmul.f32 %v3431_v57, %v613_v41  ;;  %1697 = vmatprep.subr.bf16.mxu1 %v2965_v31  ;;  %v722_v50 = vmax.f32 %v690_v40, 0.0 }
 0x18f   : > { %v582_v45 = vpop.trf.xlu0 }
 0x190   : > { %v707_v48 = vmax.f32 %v675_v39, 0.0  ;;  %v637_v49 = vmul.f32 %v3431_v57, %v582_v45  ;;  %v691_v51 = vadd.f32 %v3437_v60, %v652_v42 }
 0x191   : > { %v614_v52 = vpop.trf.xlu1  ;;  %1698 = vmatpush1.bf16.msra.mxu1 %v2964_v36 }
 0x192   : > { %v736_v54 = vpack.c.bf16 %v707_v48, %v706_v44  ;;  %v723_v55 = vmax.f32 %v691_v51, 0.0  ;;  %v653_v56 = vmul.f32 %v3431_v57, %v614_v52  ;;  %1699 = vmatprep.subr.bf16.mxu1 %v2957_v43  ;;  %v676_v59 = vadd.f32 %v3437_v60, %v637_v49 }
 0x193   : > { %v583_v62 = vpop.trf.xlu0 }
 0x194   : > { %v638_v3 = vmul.f32 %v3431_v57, %v583_v62  ;;  %3017 = vmatprep.mubr.msk.bf16.mxu1 %vm782_vm3, %v736_v54  ;;  %v3473_v4 = vpack.c.bf16 %v723_v55, %v722_v50  ;;  %v692_v5 = vadd.f32 %v3437_v60, %v653_v56  ;;  %v708_v11 = vmax.f32 %v676_v59, 0.0 }
 0x195   : > { %v615_v6 = vpop.trf.xlu1  ;;  %1700 = vmatpush1.bf16.msra.mxu1 %v2956_v53 }
 0x196   : > { %v677_v8 = vadd.f32 %v3437_v60, %v638_v3  ;;  %v654_v9 = vmul.f32 %v3431_v57, %v615_v6  ;;  %1701 = vmatprep.subr.bf16.mxu1 %v2949_v58  ;;  %v724_v15 = vmax.f32 %v692_v5, 0.0  ;;  %v647_v6 = vmul.f32 %v3431_v57, %v3439_v61 }
 0x197   : > { %v584_v12 = vpop.trf.xlu0 }
 0x198   : > { %v709_v13 = vmax.f32 %v677_v8, 0.0  ;;  %v639_v14 = vmul.f32 %v3431_v57, %v584_v12  ;;  %v693_v16 = vadd.f32 %v3437_v60, %v654_v9 }
 0x199   : > { %v616_v17 = vpop.trf.xlu1  ;;  %1702 = vmatpush1.bf16.msra.mxu1 %v2948_v7  ;;  %v648_v7 = vmul.f32 %v3431_v57, %v3443_v2 }
 0x19a   : > { %v737_v19 = vpack.c.bf16 %v709_v13, %v708_v11  ;;  %v725_v20 = vmax.f32 %v693_v16, 0.0  ;;  %v655_v21 = vmul.f32 %v3431_v57, %v616_v17  ;;  %1703 = vmatprep.subr.bf16.mxu1 %v2941_v10  ;;  %v678_v22 = vadd.f32 %v3437_v60, %v639_v14 }
 0x19b   : > { %v585_v23 = vpop.trf.xlu0  ;;  %v686_v17 = vadd.f32 %v3437_v60, %v647_v6  ;;  %v687_v61 = vadd.f32 %v3437_v60, %v648_v7  ;;  %v1177_v6 = vld [vmem:[#allocation3 + $0x1d8] sm:$0xff] }
 0x19c   : > { %v640_v24 = vmul.f32 %v3431_v57, %v585_v23  ;;  %3018 = vmatmul.mubr.msk.bf16.gmra.mxu1 %vm782_vm3, %v737_v19  ;;  %v3484_v25 = vpack.c.bf16 %v725_v20, %v724_v15  ;;  %v694_v26 = vadd.f32 %v3437_v60, %v655_v21  ;;  %v710_v30 = vmax.f32 %v678_v22, 0.0  ;;  %v1181_v7 = vld [vmem:[#allocation3 + $0x1f8] sm:$0xff] }
 0x19d   : > { %v617_v27 = vpop.trf.xlu1  ;;  %1704 = vmatpush1.bf16.msra.mxu1 %v2940_v18 }
 0x19e   : > { %v679_v28 = vadd.f32 %v3437_v60, %v640_v24  ;;  %v656_v29 = vmul.f32 %v3431_v57, %v617_v27  ;;  %v726_v34 = vmax.f32 %v694_v26, 0.0  ;;  %v718_v27 = vmax.f32 %v686_v17, 0.0 }
 0x19f   : > { %v586_v31 = vpop.trf.xlu0 }
 0x1a0   : > { %v711_v32 = vmax.f32 %v679_v28, 0.0  ;;  %v641_v33 = vmul.f32 %v3431_v57, %v586_v31  ;;  %v695_v35 = vadd.f32 %v3437_v60, %v656_v29  ;;  %v719_v28 = vmax.f32 %v687_v61, 0.0 }
 0x1a1   : > { %v618_v37 = vpop.trf.xlu1 }
 0x1a2   : > { %v738_v40 = vpack.c.bf16 %v711_v32, %v710_v30  ;;  %v727_v41 = vmax.f32 %v695_v35, 0.0  ;;  %v657_v36 = vmul.f32 %v3431_v57, %v618_v37  ;;  %v680_v39 = vadd.f32 %v3437_v60, %v641_v33 }
 0x1a3   : > { %v587_v42 = vpop.trf.xlu0  ;;  %v742_v37 = vpack.c.bf16 %v719_v28, %v718_v27 }
 0x1a4   : > { %v642_v43 = vmul.f32 %v3431_v57, %v587_v42  ;;  %3021 = vmatprep.mubr.msk.bf16.mxu1 %vm782_vm3, %v738_v40  ;;  %v3495_v44 = vpack.c.bf16 %v727_v41, %v726_v34  ;;  %v696_v45 = vadd.f32 %v3437_v60, %v657_v36  ;;  %v712_v49 = vmax.f32 %v680_v39, 0.0  ;;  %v1138_v39 = vld [vmem:[#allocation3 + $0xa0] sm:$0xff]  ;;  %v1135_v42 = vld [vmem:[#allocation3 + $0x88] sm:$0xff] }
 0x1a5   : > { %v619_v46 = vpop.trf.xlu1 }
 0x1a6   : > { %v681_v47 = vadd.f32 %v3437_v60, %v642_v43  ;;  %v658_v48 = vmul.f32 %v3431_v57, %v619_v46  ;;  %v728_v53 = vmax.f32 %v696_v45, 0.0  ;;  %v1139_v43 = vld [vmem:[#allocation3 + $0xa8] sm:$0xff] }
 0x1a7   : > { %v588_v50 = vpop.trf.xlu0  ;;  %v2932_v46 = vcombine.low %v1135_v42, %v1139_v43 }
 0x1a8   : > { %v713_v51 = vmax.f32 %v681_v47, 0.0  ;;  %v643_v52 = vmul.f32 %v3431_v57, %v588_v50  ;;  %v697_v54 = vadd.f32 %v3437_v60, %v658_v48  ;;  %v2933_v47 = vcombine.high %v1135_v42, %v1139_v43  ;;  %v1130_v48 = vld [vmem:[#allocation3 + $0x60] sm:$0xff]  ;;  %v1152_v43 = vld [vmem:[#allocation3 + $0x110] sm:$0xff] }
 0x1a9   : > { %v620_v55 = vpop.trf.xlu1 }
 0x1aa   : > { %v739_v56 = vpack.c.bf16 %v713_v51, %v712_v49  ;;  %v729_v58 = vmax.f32 %v697_v54, 0.0  ;;  %v659_v59 = vmul.f32 %v3431_v57, %v620_v55  ;;  %v682_v62 = vadd.f32 %v3437_v60, %v643_v52  ;;  %1705 = vmatprep.subr.bf16.mxu1 %v2933_v47  ;;  %v1119_v54 = vld [vmem:[#allocation3 + $0x8] sm:$0xff]  ;;  %v1153_v47 = vld [vmem:[#allocation3 + $0x118] sm:$0xff] }
 0x1ab   : > { %v589_v63 = vpop.trf.xlu0  ;;  %1706 = vmatpush1.bf16.msra.mxu1 %v2932_v46 }
 0x1ac   : > { %v644_v1 = vmul.f32 %v3431_v57, %v589_v63  ;;  %3022 = vmatmul.mubr.msk.bf16.gmra.mxu1 %vm782_vm3, %v739_v56  ;;  %v3506_v3 = vpack.c.bf16 %v729_v58, %v728_v53  ;;  %v698_v5 = vadd.f32 %v3437_v60, %v659_v59  ;;  %v714_v11 = vmax.f32 %v682_v62, 0.0  ;;  %v1122_v53 = vld [vmem:[#allocation3 + $0x20] sm:$0xff]  ;;  %v1123_v56 = vld [vmem:[#allocation3 + $0x28] sm:$0xff]  ;;  %v1176_v63 = vld [vmem:[#allocation3 + $0x1d0] sm:$0xff] }
 0x1ad   : > { %v621_v8 = vpop.trf.xlu1  ;;  %v2916_v59 = vcombine.low %v1119_v54, %v1123_v56  ;;  %v2917_v62 = vcombine.high %v1119_v54, %v1123_v56  ;;  %v1148_v54 = vld [vmem:[#allocation3 + $0xf0] sm:$0xff] }
 0x1ae   : > { %v683_v9 = vadd.f32 %v3437_v60, %v644_v1  ;;  %v660_v10 = vmul.f32 %v3431_v57, %v621_v8  ;;  %v730_v15 = vmax.f32 %v698_v5, 0.0  ;;  %v1180_v1 = vld [vmem:[#allocation3 + $0x1f0] sm:$0xff]  ;;  %v3542_v8 = vcombine.high %v1177_v6, %v1181_v7 }
 0x1af   : > { %v590_v12 = vpop.trf.xlu0  ;;  %v2975_v5 = vcombine.high %v1176_v63, %v1180_v1 }
 0x1b0   : > { %v715_v13 = vmax.f32 %v683_v9, 0.0  ;;  %v645_v14 = vmul.f32 %v3431_v57, %v590_v12  ;;  %v699_v16 = vadd.f32 %v3437_v60, %v660_v10  ;;  %v3548_v10 = vld [vmem:[%s4083_s5] ss:$0 sm:$0xff] }
 0x1b1   : > { %v622_v18 = vpop.trf.xlu1 }
 0x1b2   : > { %v740_v19 = vpack.c.bf16 %v715_v13, %v714_v11  ;;  %v731_v2 = vmax.f32 %v699_v16, 0.0  ;;  %v661_v20 = vmul.f32 %v3431_v57, %v622_v18  ;;  %v684_v22 = vadd.f32 %v3437_v60, %v645_v14  ;;  %v3554_v14 = vld [vmem:[%s4084_s6] ss:$0 sm:$0xff] }
 0x1b3   : > { %v591_v21 = vpop.trf.xlu0 }
 0x1b4   : > { %v646_v23 = vmul.f32 %v3431_v57, %v591_v21  ;;  %3025 = vmatprep.mubr.msk.bf16.mxu1 %vm782_vm3, %v740_v19  ;;  %v748_v24 = vpack.c.bf16 %v731_v2, %v730_v15  ;;  %v700_v26 = vadd.f32 %v3437_v60, %v661_v20  ;;  %v716_v32 = vmax.f32 %v684_v22, 0.0  ;;  %v1168_v19 = vld [vmem:[#allocation3 + $0x190] sm:$0xff] }
 0x1b5   : > { %v623_v29 = vpop.trf.xlu1  ;;  %v1172_v2 = vld [vmem:[#allocation3 + $0x1b0] sm:$0xff] }
 0x1b6   : > { %v685_v30 = vadd.f32 %v3437_v60, %v646_v23  ;;  %v662_v31 = vmul.f32 %v3431_v57, %v623_v29  ;;  %v732_v34 = vmax.f32 %v700_v26, 0.0  ;;  %v1134_v57 = vld [vmem:[#allocation3 + $0x80] sm:$0xff]  ;;  %v1169_v23 = vld [vmem:[#allocation3 + $0x198] sm:$0xff]  ;;  %v2967_v28 = vcombine.high %v1168_v19, %v1172_v2  ;;  %v1160_v29 = vld [vmem:[#allocation3 + $0x150] sm:$0xff] }
 0x1b7   : > { %v2930_v45 = vcombine.low %v1134_v57, %v1138_v39 }
 0x1b8   : > { %v717_v33 = vmax.f32 %v685_v30, 0.0  ;;  %v701_v35 = vadd.f32 %v3437_v60, %v662_v31  ;;  %v2931_v60 = vcombine.high %v1134_v57, %v1138_v39  ;;  %v1164_v30 = vld [vmem:[#allocation3 + $0x170] sm:$0xff]  ;;  %v3564_v31 = vcombine.low %v1177_v6, %v1181_v7  ;;  %v1161_v57 = vld [vmem:[#allocation3 + $0x158] sm:$0xff] }
 0x1b9   : > { %v1165_v39 = vld [vmem:[#allocation3 + $0x178] sm:$0xff] }
 0x1ba   : > { %v741_v40 = vpack.c.bf16 %v717_v33, %v716_v32  ;;  %v733_v41 = vmax.f32 %v701_v35, 0.0  ;;  %1512 = vmatprep.subr.bf16.mxu0 %v2931_v60  ;;  %v2966_v35 = vcombine.low %v1168_v19, %v1172_v2 }
 0x1bb   : > { %1513 = vmatpush1.bf16.msra.mxu0 %v2930_v45  ;;  %v1156_v45 = vld [vmem:[#allocation3 + $0x130] sm:$0xff] }
 0x1bc   : > { %3026 = vmatmul.mubr.msk.bf16.gmra.mxu1 %vm782_vm3, %v741_v40  ;;  %v749_v36 = vpack.c.bf16 %v733_v41, %v732_v34  ;;  %v2959_v40 = vcombine.high %v1160_v29, %v1164_v30 }
 0x1bd   : > { %3029 = vmatprep.mubr.msk.bf16.mxu1 %vm782_vm3, %v742_v37 }
 0x1c4   : > { %3030 = vmatmul.mubr.msk.bf16.gmra.mxu1 %vm782_vm3, %v3462_v38  ;;  %v1126_v38 = vld [vmem:[#allocation3 + $0x40] sm:$0xff] }
 0x1c5   : > { %3033 = vmatprep.mubr.msk.bf16.mxu1 %vm782_vm3, %v3473_v4  ;;  %v1127_v4 = vld [vmem:[#allocation3 + $0x48] sm:$0xff]  ;;  %v2923_v49 = vcombine.high %v1126_v38, %v1130_v48  ;;  %v2922_v50 = vcombine.low %v1126_v38, %v1130_v48  ;;  %v1157_v38 = vld [vmem:[#allocation3 + $0x138] sm:$0xff] }
 0x1c7   : > { %1514 = vmatprep.subr.bf16.mxu0 %v2923_v49  ;;  %v3580_v49 = vcombine.high %v1161_v57, %v1165_v39 }
 0x1c8   : > { %1515 = vmatpush1.bf16.msra.mxu0 %v2922_v50  ;;  %v2951_v50 = vcombine.high %v1152_v43, %v1156_v45 }
 0x1cc   : > { %3034 = vmatmul.mubr.msk.bf16.gmra.mxu1 %vm782_vm3, %v3484_v25  ;;  %v1131_v25 = vld [vmem:[#allocation3 + $0x68] sm:$0xff] }
 0x1cd   : > { %3037 = vmatprep.mubr.msk.bf16.mxu1 %vm782_vm3, %v3495_v44  ;;  %v2924_v51 = vcombine.low %v1127_v4, %v1131_v25  ;;  %v2925_v52 = vcombine.high %v1127_v4, %v1131_v25  ;;  %v1118_v44 = vld [vmem:[#allocation3] sm:$0xff]  ;;  %v2958_v4 = vcombine.low %v1160_v29, %v1164_v30 }
 0x1ce   : > { %v2915_v55 = vcombine.high %v1118_v44, %v1122_v53  ;;  %v2914_v58 = vcombine.low %v1118_v44, %v1122_v53  ;;  %v1144_v53 = vld [vmem:[#allocation3 + $0xd0] sm:$0xff] }
 0x1cf   : > { %1707 = vmatprep.subr.bf16.mxu1 %v2925_v52 }
 0x1d0   : > { %1708 = vmatpush1.bf16.msra.mxu1 %v2924_v51  ;;  %1516 = vmatprep.subr.bf16.mxu0 %v2915_v55  ;;  %v3583_v51 = vcombine.low %v1161_v57, %v1165_v39  ;;  %v3589_v55 = vcombine.high %v1153_v47, %v1157_v38  ;;  %v1121_v39 = vld [vmem:[#allocation3 + $0x18] sm:$0xff] }
 0x1d1   : > { %1517 = vmatpush1.bf16.msra.mxu0 %v2914_v58  ;;  %1709 = vmatprep.subr.bf16.mxu1 %v2917_v62  ;;  %v2943_v62 = vcombine.high %v1144_v53, %v1148_v54 }
 0x1d2   : > { %1888 = vmatprep.subr.bf16.mxu0 %v2975_v5 }
 0x1d4   : > { %3038 = vmatmul.mubr.msk.bf16.gmra.mxu1 %vm782_vm3, %v3506_v3  ;;  %v2974_v3 = vcombine.low %v1176_v63, %v1180_v1  ;;  %v3597_v63 = vcombine.low %v1153_v47, %v1157_v38  ;;  %v1145_v1 = vld [vmem:[#allocation3 + $0xd8] sm:$0xff] }
 0x1d5   : > { %3041 = vmatprep.mubr.msk.bf16.mxu1 %vm782_vm3, %v748_v24  ;;  %1710 = vmatpush1.bf16.msra.mxu1 %v2916_v59  ;;  %v1173_v24 = vld [vmem:[#allocation3 + $0x1b8] sm:$0xff]  ;;  %v2950_v59 = vcombine.low %v1152_v43, %v1156_v45 }
 0x1d6   : > { %3045 = vmatprep.subr.bf16.mxu1 %v3542_v8  ;;  %v3569_v33 = vcombine.high %v1169_v23, %v1173_v24 }
 0x1dc   : > { %3042 = vmatmul.mubr.msk.bf16.gmra.mxu1 %vm782_vm3, %v749_v36  ;;  %v3574_v36 = vcombine.low %v1169_v23, %v1173_v24 }
 0x1dd   : > { %1727 = vmatprep.mubr.bf16.mxu1 %v3253_v0 }
 0x24c   : > { %v3015_v9 = vpop.f32.mrf.mxu1 }
 0x24d   : > { %v1001_v20 = vmul.f32 %v3015_v9, %v3548_v10  ;;  %v1136_v9 = vld [vmem:[#allocation3 + $0x90] sm:$0xff] }
 0x24e   : > { %v865_v11 = vpop.f32.mrf.mxu1 }
 0x24f   : > { %v999_v12 = vmul.f32 %v3548_v10, %v865_v11  ;;  %v1040_v32 = vadd.f32 %v3554_v14, %v1001_v20  ;;  %v1140_v11 = vld [vmem:[#allocation3 + $0xb0] sm:$0xff] }
 0x250   : > { %v3016_v13 = vpop.f32.mrf.mxu1  ;;  %v1128_v20 = vld [vmem:[#allocation3 + $0x50] sm:$0xff] }
 0x251   : > { %v1038_v16 = vadd.f32 %v3554_v14, %v999_v12  ;;  %v1002_v61 = vmul.f32 %v3016_v13, %v3548_v10  ;;  %v1072_v60 = vmax.f32 %v1040_v32, 0.0  ;;  %v1137_v12 = vld [vmem:[#allocation3 + $0x98] sm:$0xff] }
 0x252   : > { %v868_v15 = vpop.f32.mrf.mxu1  ;;  %v1141_v13 = vld [vmem:[#allocation3 + $0xb8] sm:$0xff] }
 0x253   : > { %v1000_v17 = vmul.f32 %v3548_v10, %v868_v15  ;;  %v1070_v21 = vmax.f32 %v1038_v16, 0.0  ;;  %v1041_v26 = vadd.f32 %v3554_v14, %v1002_v61  ;;  %v3618_v30 = vcombine.low %v1137_v12, %v1141_v13  ;;  %v1129_v32 = vld [vmem:[#allocation3 + $0x58] sm:$0xff] }
 0x255   : > { %v1039_v18 = vadd.f32 %v3554_v14, %v1000_v17  ;;  %v1073_v37 = vmax.f32 %v1041_v26, 0.0  ;;  %v2942_v17 = vcombine.low %v1144_v53, %v1148_v54  ;;  %v2934_v26 = vcombine.low %v1136_v9, %v1140_v11 }
 0x257   : > { %v1071_v22 = vmax.f32 %v1039_v18, 0.0  ;;  %v3578_v48 = vpack.c.bf16 %v1073_v37, %v1072_v60  ;;  %v2935_v18 = vcombine.high %v1136_v9, %v1140_v11  ;;  %v1125_v60 = vld [vmem:[#allocation3 + $0x38] sm:$0xff] }
 0x258   : > { %v3641_v54 = vcombine.low %v1121_v39, %v1125_v60 }
 0x259   : > { %v3562_v27 = vpack.c.bf16 %v1071_v22, %v1070_v21  ;;  %v1132_v21 = vld [vmem:[#allocation3 + $0x70] sm:$0xff]  ;;  %v3612_v22 = vcombine.high %v1137_v12, %v1141_v13 }
 0x25a   : > { %v2927_v29 = vcombine.high %v1128_v20, %v1132_v21  ;;  %v2926_v43 = vcombine.low %v1128_v20, %v1132_v21 }
 0x25b   : > { %1535 = vmatmul.mubr.bf16.vlgmr.msra.gmra.mxu0 %v3562_v27  ;;  %1728 = vmatmul.mubr.bf16.vlgmr.msra.gmra.mxu1 %v3562_v27 }
 0x25c   : > { %1889 = vmatpush1.bf16.msra.mxu0 %v2974_v3  ;;  %v3019_v34 = vpop.f32.mrf.mxu1  ;;  %1544 = vmatprep.mubr.bf16.mxu0 %v3253_v0  ;;  %v1149_v3 = vld [vmem:[#allocation3 + $0xf8] sm:$0xff] }
 0x25d   : > { %1737 = vmatprep.mubr.bf16.mxu1 %v3253_v0  ;;  %1890 = vmatprep.subr.bf16.mxu0 %v2967_v28  ;;  %v1005_v5 = vmul.f32 %v3019_v34, %v3548_v10  ;;  %v3604_v61 = vcombine.high %v1145_v1, %v1149_v3  ;;  %v3607_v19 = vcombine.low %v1145_v1, %v1149_v3  ;;  %v1133_v34 = vld [vmem:[#allocation3 + $0x78] sm:$0xff] }
 0x25e   : > { %v881_v41 = vpop.f32.mrf.mxu1  ;;  %3053 = vmatpush1.bf16.msra.mxu1 %v3564_v31  ;;  %v3624_v45 = vcombine.high %v1129_v32, %v1133_v34  ;;  %v3627_v38 = vcombine.low %v1129_v32, %v1133_v34 }
 0x25f   : > { %v1003_v42 = vmul.f32 %v3548_v10, %v881_v41  ;;  %3046 = vmatprep.subr.bf16.mxu1 %v3569_v33  ;;  %v1044_v2 = vadd.f32 %v3554_v14, %v1005_v5  ;;  %v1124_v41 = vld [vmem:[#allocation3 + $0x30] sm:$0xff] }
 0x260   : > { %v3020_v46 = vpop.f32.mrf.mxu1  ;;  %1891 = vmatpush1.bf16.msra.mxu0 %v2966_v35 }
 0x261   : > { %1892 = vmatprep.subr.bf16.mxu0 %v2959_v40  ;;  %v1042_v52 = vadd.f32 %v3554_v14, %v1003_v42  ;;  %v1006_v56 = vmul.f32 %v3020_v46, %v3548_v10  ;;  %v1076_v35 = vmax.f32 %v1044_v2, 0.0  ;;  %v1120_v40 = vld [vmem:[#allocation3 + $0x10] sm:$0xff] }
 0x262   : > { %v884_v25 = vpop.f32.mrf.mxu1  ;;  %3054 = vmatpush1.bf16.msra.mxu1 %v3574_v36  ;;  %v2919_v47 = vcombine.high %v1120_v40, %v1124_v41  ;;  %v2918_v53 = vcombine.low %v1120_v40, %v1124_v41 }
 0x263   : > { %v1004_v44 = vmul.f32 %v3548_v10, %v884_v25  ;;  %1545 = vmatmul.mubr.bf16.gmra.mxu0 %v3578_v48  ;;  %1738 = vmatmul.mubr.bf16.gmra.mxu1 %v3578_v48  ;;  %v1074_v6 = vmax.f32 %v1042_v52, 0.0  ;;  %v1045_v15 = vadd.f32 %v3554_v14, %v1006_v56 }
 0x264   : > { %1554 = vmatprep.mubr.bf16.mxu0 %v3253_v0  ;;  %1747 = vmatprep.mubr.bf16.mxu1 %v3253_v0 }
 0x265   : > { %v1043_v58 = vadd.f32 %v3554_v14, %v1004_v44  ;;  %1893 = vmatpush1.bf16.msra.mxu0 %v2958_v4  ;;  %3047 = vmatprep.subr.bf16.mxu1 %v3580_v49  ;;  %v1077_v24 = vmax.f32 %v1045_v15, 0.0 }
 0x266   : > { %1894 = vmatprep.subr.bf16.mxu0 %v2951_v50  ;;  %3055 = vmatpush1.bf16.msra.mxu1 %v3583_v51  ;;  %v3633_v50 = vcombine.high %v1121_v39, %v1125_v60 }
 0x267   : > { %v1075_v7 = vmax.f32 %v1043_v58, 0.0  ;;  %3048 = vmatprep.subr.bf16.mxu1 %v3589_v55  ;;  %v3622_v42 = vpack.c.bf16 %v1077_v24, %v1076_v35 }
 0x269   : > { %v3602_v16 = vpack.c.bf16 %v1075_v7, %v1074_v6  ;;  %1895 = vmatpush1.bf16.msra.mxu0 %v2950_v59 }
 0x26a   : > { %1896 = vmatprep.subr.bf16.mxu0 %v2943_v62  ;;  %3056 = vmatpush1.bf16.msra.mxu1 %v3597_v63 }
 0x26b   : > { %1555 = vmatmul.mubr.bf16.gmra.mxu0 %v3602_v16  ;;  %1748 = vmatmul.mubr.bf16.gmra.mxu1 %v3602_v16 }
 0x26c   : > { %v3023_v23 = vpop.f32.mrf.mxu1  ;;  %1564 = vmatprep.mubr.bf16.mxu0 %v3253_v0  ;;  %1757 = vmatprep.mubr.bf16.mxu1 %v3253_v0 }
 0x26d   : > { %1897 = vmatpush1.bf16.msra.mxu0 %v2942_v17  ;;  %3049 = vmatprep.subr.bf16.mxu1 %v3604_v61  ;;  %v1009_v56 = vmul.f32 %v3023_v23, %v3548_v10 }
 0x26e   : > { %v897_v28 = vpop.f32.mrf.mxu1  ;;  %1898 = vmatprep.subr.bf16.mxu0 %v2935_v18  ;;  %3057 = vmatpush1.bf16.msra.mxu1 %v3607_v19 }
 0x26f   : > { %v1007_v37 = vmul.f32 %v3548_v10, %v897_v28  ;;  %3050 = vmatprep.subr.bf16.mxu1 %v3612_v22  ;;  %v1048_v3 = vadd.f32 %v3554_v14, %v1009_v56 }
 0x270   : > { %v3024_v57 = vpop.f32.mrf.mxu1 }
 0x271   : > { %1899 = vmatpush1.bf16.msra.mxu0 %v2934_v26  ;;  %v1046_v4 = vadd.f32 %v3554_v14, %v1007_v37  ;;  %v1010_v52 = vmul.f32 %v3024_v57, %v3548_v10  ;;  %v1080_v9 = vmax.f32 %v1048_v3, 0.0 }
 0x272   : > { %v900_v46 = vpop.f32.mrf.mxu1  ;;  %1900 = vmatprep.subr.bf16.mxu0 %v2927_v29  ;;  %3058 = vmatpush1.bf16.msra.mxu1 %v3618_v30 }
 0x273   : > { %v1008_v25 = vmul.f32 %v3548_v10, %v900_v46  ;;  %1565 = vmatmul.mubr.bf16.gmra.mxu0 %v3622_v42  ;;  %1758 = vmatmul.mubr.bf16.gmra.mxu1 %v3622_v42  ;;  %v1078_v58 = vmax.f32 %v1046_v4, 0.0  ;;  %v1049_v62 = vadd.f32 %v3554_v14, %v1010_v52 }
 0x274   : > { %1574 = vmatprep.mubr.bf16.mxu0 %v3253_v0  ;;  %1767 = vmatprep.mubr.bf16.mxu1 %v3253_v0 }
 0x275   : > { %v1047_v44 = vadd.f32 %v3554_v14, %v1008_v25  ;;  %1901 = vmatpush1.bf16.msra.mxu0 %v2926_v43  ;;  %3051 = vmatprep.subr.bf16.mxu1 %v3624_v45  ;;  %v1081_v6 = vmax.f32 %v1049_v62, 0.0 }
 0x276   : > { %1902 = vmatprep.subr.bf16.mxu0 %v2919_v47  ;;  %3059 = vmatpush1.bf16.msra.mxu1 %v3627_v38 }
 0x277   : > { %v1079_v59 = vmax.f32 %v1047_v44, 0.0  ;;  %3052 = vmatprep.subr.bf16.mxu1 %v3633_v50  ;;  %v3656_v13 = vpack.c.bf16 %v1081_v6, %v1080_v9 }
 0x279   : > { %v3646_v1 = vpack.c.bf16 %v1079_v59, %v1078_v58  ;;  %1903 = vmatpush1.bf16.msra.mxu0 %v2918_v53 }
 0x27a   : > { %3060 = vmatpush1.bf16.msra.mxu1 %v3641_v54  ;;  %2081 = vmatprep.subr.bf16.mxu0 %v3542_v8 }
 0x27b   : > { %1575 = vmatmul.mubr.bf16.gmra.mxu0 %v3646_v1  ;;  %1768 = vmatmul.mubr.bf16.gmra.mxu1 %v3646_v1 }
 0x27c   : > { %v3027_v5 = vpop.f32.mrf.mxu1  ;;  %1584 = vmatprep.mubr.bf16.mxu0 %v3253_v0  ;;  %1777 = vmatprep.mubr.bf16.mxu1 %v3253_v0 }
 0x27d   : > { %v1013_v23 = vmul.f32 %v3027_v5, %v3548_v10 }
 0x27e   : > { %v913_v7 = vpop.f32.mrf.mxu1 }
 0x27f   : > { %v1011_v11 = vmul.f32 %v3548_v10, %v913_v7  ;;  %v1052_v35 = vadd.f32 %v3554_v14, %v1013_v23 }
 0x280   : > { %v3028_v12 = vpop.f32.mrf.mxu1 }
 0x281   : > { %v1050_v15 = vadd.f32 %v3554_v14, %v1011_v11  ;;  %v1014_v2 = vmul.f32 %v3028_v12, %v3548_v10  ;;  %v1084_v57 = vmax.f32 %v1052_v35, 0.0 }
 0x282   : > { %v916_v8 = vpop.f32.mrf.mxu1 }
 0x283   : > { %v1012_v17 = vmul.f32 %v3548_v10, %v916_v8  ;;  %1585 = vmatmul.mubr.bf16.gmra.mxu0 %v3656_v13  ;;  %1778 = vmatmul.mubr.bf16.gmra.mxu1 %v3656_v13  ;;  %v1082_v24 = vmax.f32 %v1050_v15, 0.0  ;;  %v1053_v29 = vadd.f32 %v3554_v14, %v1014_v2 }
 0x284   : > { %v3031_v18 = vpop.f32.mrf.mxu1  ;;  %1594 = vmatprep.mubr.bf16.mxu0 %v3253_v0  ;;  %1787 = vmatprep.mubr.bf16.mxu1 %v3253_v0 }
 0x285   : > { %v1051_v20 = vadd.f32 %v3554_v14, %v1012_v17  ;;  %v1085_v37 = vmax.f32 %v1053_v29, 0.0  ;;  %v1017_v4 = vmul.f32 %v3031_v18, %v3548_v10 }
 0x286   : > { %v929_v21 = vpop.f32.mrf.mxu1 }
 0x287   : > { %v1083_v26 = vmax.f32 %v1051_v20, 0.0  ;;  %v1015_v39 = vmul.f32 %v3548_v10, %v929_v21  ;;  %v3677_v60 = vpack.c.bf16 %v1085_v37, %v1084_v57  ;;  %v1056_v56 = vadd.f32 %v3554_v14, %v1017_v4 }
 0x288   : > { %v3032_v28 = vpop.f32.mrf.mxu1 }
 0x289   : > { %v3668_v32 = vpack.c.bf16 %v1083_v26, %v1082_v24  ;;  %v1054_v47 = vadd.f32 %v3554_v14, %v1015_v39  ;;  %v1018_v25 = vmul.f32 %v3032_v28, %v3548_v10  ;;  %v1088_v3 = vmax.f32 %v1056_v56, 0.0 }
 0x28a   : > { %v932_v34 = vpop.f32.mrf.mxu1 }
 0x28b   : > { %1595 = vmatmul.mubr.bf16.gmra.mxu0 %v3668_v32  ;;  %1788 = vmatmul.mubr.bf16.gmra.mxu1 %v3668_v32  ;;  %v1016_v40 = vmul.f32 %v3548_v10, %v932_v34  ;;  %v1086_v53 = vmax.f32 %v1054_v47, 0.0  ;;  %v1057_v58 = vadd.f32 %v3554_v14, %v1018_v25 }
 0x28c   : > { %1604 = vmatprep.mubr.bf16.mxu0 %v3253_v0  ;;  %1797 = vmatprep.mubr.bf16.mxu1 %v3253_v0  ;;  %v3035_v41 = vpop.f32.mrf.mxu1 }
 0x28d   : > { %v1055_v43 = vadd.f32 %v3554_v14, %v1016_v40  ;;  %v1089_v5 = vmax.f32 %v1057_v58, 0.0  ;;  %v1021_v17 = vmul.f32 %v3035_v41, %v3548_v10 }
 0x28e   : > { %v945_v46 = vpop.f32.mrf.mxu1 }
 0x28f   : > { %v1087_v52 = vmax.f32 %v1055_v43, 0.0  ;;  %v1019_v6 = vmul.f32 %v3548_v10, %v945_v46  ;;  %v3697_v11 = vpack.c.bf16 %v1089_v5, %v1088_v3  ;;  %v1060_v23 = vadd.f32 %v3554_v14, %v1021_v17 }
 0x290   : > { %v3036_v44 = vpop.f32.mrf.mxu1 }
 0x291   : > { %v3689_v59 = vpack.c.bf16 %v1087_v52, %v1086_v53  ;;  %v1058_v12 = vadd.f32 %v3554_v14, %v1019_v6  ;;  %v1022_v2 = vmul.f32 %v3036_v44, %v3548_v10  ;;  %v1092_v29 = vmax.f32 %v1060_v23, 0.0 }
 0x292   : > { %v948_v62 = vpop.f32.mrf.mxu1 }
 0x293   : > { %1605 = vmatmul.mubr.bf16.gmra.mxu0 %v3677_v60  ;;  %1798 = vmatmul.mubr.bf16.gmra.mxu1 %v3677_v60  ;;  %v1020_v7 = vmul.f32 %v3548_v10, %v948_v62  ;;  %v1090_v18 = vmax.f32 %v1058_v12, 0.0  ;;  %v1061_v24 = vadd.f32 %v3554_v14, %v1022_v2 }
 0x294   : > { %1614 = vmatprep.mubr.bf16.mxu0 %v3253_v0  ;;  %1807 = vmatprep.mubr.bf16.mxu1 %v3253_v0  ;;  %v3039_v9 = vpop.f32.mrf.mxu1 }
 0x295   : > { %v1059_v8 = vadd.f32 %v3554_v14, %v1020_v7  ;;  %v1093_v34 = vmax.f32 %v1061_v24, 0.0  ;;  %v1025_v46 = vmul.f32 %v3039_v9, %v3548_v10 }
 0x296   : > { %v961_v15 = vpop.f32.mrf.mxu1 }
 0x297   : > { %v1091_v20 = vmax.f32 %v1059_v8, 0.0  ;;  %v1023_v35 = vmul.f32 %v3548_v10, %v961_v15  ;;  %v3717_v41 = vpack.c.bf16 %v1093_v34, %v1092_v29  ;;  %v1064_v44 = vadd.f32 %v3554_v14, %v1025_v46 }
 0x298   : > { %v3040_v21 = vpop.f32.mrf.mxu1 }
 0x299   : > { %v3709_v26 = vpack.c.bf16 %v1091_v20, %v1090_v18  ;;  %v1062_v57 = vadd.f32 %v3554_v14, %v1023_v35  ;;  %v1026_v4 = vmul.f32 %v3040_v21, %v3548_v10  ;;  %v1096_v62 = vmax.f32 %v1064_v44, 0.0 }
 0x29a   : > { %v964_v28 = vpop.f32.mrf.mxu1 }
 0x29b   : > { %1615 = vmatmul.mubr.bf16.gmra.mxu0 %v3689_v59  ;;  %1808 = vmatmul.mubr.bf16.gmra.mxu1 %v3689_v59  ;;  %v1024_v37 = vmul.f32 %v3548_v10, %v964_v28  ;;  %v1094_v47 = vmax.f32 %v1062_v57, 0.0  ;;  %v1065_v53 = vadd.f32 %v3554_v14, %v1026_v4 }
 0x29c   : > { %1624 = vmatprep.mubr.bf16.mxu0 %v3253_v0  ;;  %1817 = vmatprep.mubr.bf16.mxu1 %v3253_v0  ;;  %v3043_v40 = vpop.f32.mrf.mxu1 }
 0x29d   : > { %v1063_v39 = vadd.f32 %v3554_v14, %v1024_v37  ;;  %v1097_v3 = vmax.f32 %v1065_v53, 0.0  ;;  %v1029_v8 = vmul.f32 %v3043_v40, %v3548_v10 }
 0x29e   : > { %v977_v43 = vpop.f32.mrf.mxu1 }
 0x29f   : > { %v1095_v25 = vmax.f32 %v1063_v39, 0.0  ;;  %v1027_v5 = vmul.f32 %v3548_v10, %v977_v43  ;;  %v3737_v7 = vpack.c.bf16 %v1097_v3, %v1096_v62  ;;  %v1068_v2 = vadd.f32 %v3554_v14, %v1029_v8 }
 0x2a0   : > { %v3044_v52 = vpop.f32.mrf.mxu1 }
 0x2a1   : > { %v3729_v56 = vpack.c.bf16 %v1095_v25, %v1094_v47  ;;  %v1066_v9 = vadd.f32 %v3554_v14, %v1027_v5  ;;  %v1030_v17 = vmul.f32 %v3044_v52, %v3548_v10  ;;  %v1100_v23 = vmax.f32 %v1068_v2, 0.0 }
 0x2a2   : > { %v980_v58 = vpop.f32.mrf.mxu1 }
 0x2a3   : > { %1625 = vmatmul.mubr.bf16.gmra.mxu0 %v3697_v11  ;;  %1818 = vmatmul.mubr.bf16.gmra.mxu1 %v3697_v11  ;;  %v1028_v6 = vmul.f32 %v3548_v10, %v980_v58  ;;  %v1098_v15 = vmax.f32 %v1066_v9, 0.0  ;;  %v1069_v20 = vadd.f32 %v3554_v14, %v1030_v17 }
 0x2a4   : > { %1634 = vmatprep.mubr.bf16.mxu0 %v3253_v0  ;;  %1827 = vmatprep.mubr.bf16.mxu1 %v3253_v0 }
 0x2a5   : > { %v1067_v12 = vadd.f32 %v3554_v14, %v1028_v6  ;;  %v1101_v24 = vmax.f32 %v1069_v20, 0.0 }
 0x2a7   : > { %v1099_v18 = vmax.f32 %v1067_v12, 0.0  ;;  %v3755_v28 = vpack.c.bf16 %v1101_v24, %v1100_v23 }
 0x2a9   : > { %v3749_v21 = vpack.c.bf16 %v1099_v18, %v1098_v15 }
 0x2ab   : > { %1635 = vmatmul.mubr.bf16.gmra.mxu0 %v3709_v26  ;;  %1828 = vmatmul.mubr.bf16.gmra.mxu1 %v3709_v26 }
 0x2ac   : > { %1644 = vmatprep.mubr.bf16.mxu0 %v3253_v0  ;;  %1837 = vmatprep.mubr.bf16.mxu1 %v3253_v0 }
 0x2b3   : > { %1645 = vmatmul.mubr.bf16.gmra.mxu0 %v3717_v41  ;;  %1838 = vmatmul.mubr.bf16.gmra.mxu1 %v3717_v41 }
 0x2b4   : > { %1654 = vmatprep.mubr.bf16.mxu0 %v3253_v0  ;;  %1847 = vmatprep.mubr.bf16.mxu1 %v3253_v0 }
 0x2bb   : > { %1655 = vmatmul.mubr.bf16.gmra.mxu0 %v3729_v56  ;;  %1848 = vmatmul.mubr.bf16.gmra.mxu1 %v3729_v56 }
 0x2bc   : > { %1664 = vmatprep.mubr.bf16.mxu0 %v3253_v0  ;;  %1857 = vmatprep.mubr.bf16.mxu1 %v3253_v0 }
 0x2c3   : > { %1665 = vmatmul.mubr.bf16.gmra.mxu0 %v3737_v7  ;;  %1858 = vmatmul.mubr.bf16.gmra.mxu1 %v3737_v7 }
 0x2c4   : > { %1674 = vmatprep.mubr.bf16.mxu0 %v3253_v0  ;;  %1867 = vmatprep.mubr.bf16.mxu1 %v3253_v0 }
 0x2cb   : > { %1675 = vmatmul.mubr.bf16.gmra.mxu0 %v3749_v21  ;;  %1868 = vmatmul.mubr.bf16.gmra.mxu1 %v3749_v21 }
 0x2cc   : > { %1684 = vmatprep.mubr.bf16.mxu0 %v3253_v0  ;;  %1877 = vmatprep.mubr.bf16.mxu1 %v3253_v0 }
 0x2d3   : > { %1685 = vmatmul.mubr.bf16.gmra.mxu0 %v3755_v28  ;;  %1878 = vmatmul.mubr.bf16.gmra.mxu1 %v3755_v28 }
 0x2d4   : > { %1920 = vmatprep.mubr.bf16.mxu0 %v3253_v0  ;;  %2133 = vmatprep.mubr.bf16.mxu1 %v3253_v0 }
 0x2db   : > { %1921 = vmatmul.mubr.bf16.vlgmr.msra.gmra.mxu0 %v3562_v27  ;;  %2134 = vmatmul.mubr.bf16.vlgmr.msra.gmra.mxu1 %v3602_v16 }
 0x2dc   : > { %2082 = vmatpush1.bf16.msra.mxu0 %v3564_v31  ;;  %1930 = vmatprep.mubr.bf16.mxu0 %v3253_v0 }
 0x2dd   : > { %2143 = vmatprep.mubr.bf16.mxu1 %v3253_v0  ;;  %2083 = vmatprep.subr.bf16.mxu0 %v3569_v33 }
 0x2e0   : > { %2084 = vmatpush1.bf16.msra.mxu0 %v3574_v36 }
 0x2e1   : > { %2085 = vmatprep.subr.bf16.mxu0 %v3580_v49 }
 0x2e3   : > { %1931 = vmatmul.mubr.bf16.gmra.mxu0 %v3578_v48  ;;  %2144 = vmatmul.mubr.bf16.gmra.mxu1 %v3622_v42 }
 0x2e4   : > { %1940 = vmatprep.mubr.bf16.mxu0 %v3253_v0  ;;  %2153 = vmatprep.mubr.bf16.mxu1 %v3253_v0 }
 0x2e5   : > { %2086 = vmatpush1.bf16.msra.mxu0 %v3583_v51 }
 0x2e6   : > { %2087 = vmatprep.subr.bf16.mxu0 %v3589_v55 }
 0x2e9   : > { %2088 = vmatpush1.bf16.msra.mxu0 %v3597_v63 }
 0x2ea   : > { %2089 = vmatprep.subr.bf16.mxu0 %v3604_v61 }
 0x2eb   : > { %1941 = vmatmul.mubr.bf16.gmra.mxu0 %v3602_v16  ;;  %2154 = vmatmul.mubr.bf16.gmra.mxu1 %v3646_v1 }
 0x2ec   : > { %1950 = vmatprep.mubr.bf16.mxu0 %v3253_v0  ;;  %2163 = vmatprep.mubr.bf16.mxu1 %v3253_v0 }
 0x2ed   : > { %2090 = vmatpush1.bf16.msra.mxu0 %v3607_v19 }
 0x2ee   : > { %2091 = vmatprep.subr.bf16.mxu0 %v3612_v22 }
 0x2f1   : > { %2092 = vmatpush1.bf16.msra.mxu0 %v3618_v30 }
 0x2f2   : > { %2093 = vmatprep.subr.bf16.mxu0 %v3624_v45 }
 0x2f3   : > { %1951 = vmatmul.mubr.bf16.gmra.mxu0 %v3622_v42  ;;  %2164 = vmatmul.mubr.bf16.gmra.mxu1 %v3656_v13 }
 0x2f4   : > { %1960 = vmatprep.mubr.bf16.mxu0 %v3253_v0  ;;  %2173 = vmatprep.mubr.bf16.mxu1 %v3253_v0 }
 0x2f5   : > { %2094 = vmatpush1.bf16.msra.mxu0 %v3627_v38 }
 0x2f6   : > { %2095 = vmatprep.subr.bf16.mxu0 %v3633_v50 }
 0x2f9   : > { %2096 = vmatpush1.bf16.msra.mxu0 %v3641_v54 }
 0x2fb   : > { %1961 = vmatmul.mubr.bf16.gmra.mxu0 %v3646_v1  ;;  %2174 = vmatmul.mubr.bf16.gmra.mxu1 %v3668_v32 }
 0x2fc   : > { %1970 = vmatprep.mubr.bf16.mxu0 %v3253_v0  ;;  %2183 = vmatprep.mubr.bf16.mxu1 %v3253_v0 }
 0x303   : > { %1971 = vmatmul.mubr.bf16.gmra.mxu0 %v3656_v13  ;;  %2184 = vmatmul.mubr.bf16.gmra.mxu1 %v3677_v60 }
 0x304   : > { %1980 = vmatprep.mubr.bf16.mxu0 %v3253_v0  ;;  %2193 = vmatprep.mubr.bf16.mxu1 %v3253_v0 }
 0x30b   : > { %1981 = vmatmul.mubr.bf16.gmra.mxu0 %v3668_v32  ;;  %2194 = vmatmul.mubr.bf16.gmra.mxu1 %v3689_v59 }
 0x30c   : > { %1990 = vmatprep.mubr.bf16.mxu0 %v3253_v0  ;;  %2203 = vmatprep.mubr.bf16.mxu1 %v3253_v0 }
 0x313   : > { %1991 = vmatmul.mubr.bf16.gmra.mxu0 %v3677_v60  ;;  %2204 = vmatmul.mubr.bf16.gmra.mxu1 %v3697_v11 }
 0x314   : > { %2000 = vmatprep.mubr.bf16.mxu0 %v3253_v0  ;;  %2213 = vmatprep.mubr.bf16.mxu1 %v3253_v0 }
 0x31b   : > { %v1536_v10 = vpop.f32.mrf.mxu0  ;;  %v1729_v14 = vpop.f32.mrf.mxu1  ;;  %2001 = vmatmul.mubr.bf16.gmra.mxu0 %v3689_v59  ;;  %2214 = vmatmul.mubr.bf16.gmra.mxu1 %v3709_v26 }
 0x31c   : > { %2010 = vmatprep.mubr.bf16.mxu0 %v3253_v0  ;;  %2223 = vmatprep.mubr.bf16.mxu1 %v3253_v0 }
 0x31d   : > { %v1538_v31 = vpop.f32.mrf.mxu0  ;;  %v1731_v33 = vpop.f32.mrf.mxu1 }
 0x31f   : > { %v1540_v36 = vpop.f32.mrf.mxu0  ;;  %v1733_v49 = vpop.f32.mrf.mxu1 }
 0x320   : > { %v2274_v51 = vmax.f32 %v1536_v10, %v1540_v36  ;;  %v2336_v55 = vmax.f32 %v1729_v14, %v1733_v49 }
 0x321   : > { %v1542_v63 = vpop.f32.mrf.mxu0  ;;  %v1735_v16 = vpop.f32.mrf.mxu1 }
 0x322   : > { %v2305_v61 = vmax.f32 %v1538_v31, %v1542_v63  ;;  %v2367_v19 = vmax.f32 %v1731_v33, %v1735_v16 }
 0x323   : > { %v1546_v22 = vpop.f32.mrf.mxu0  ;;  %v1739_v30 = vpop.f32.mrf.mxu1  ;;  %2011 = vmatmul.mubr.bf16.gmra.mxu0 %v3697_v11  ;;  %2224 = vmatmul.mubr.bf16.gmra.mxu1 %v3717_v41 }
 0x324   : > { %v2275_v42 = vmax.f32 %v2274_v51, %v1546_v22  ;;  %v2337_v45 = vmax.f32 %v2336_v55, %v1739_v30  ;;  %2020 = vmatprep.mubr.bf16.mxu0 %v3253_v0  ;;  %2233 = vmatprep.mubr.bf16.mxu1 %v3253_v0 }
 0x325   : > { %v1548_v38 = vpop.f32.mrf.mxu0  ;;  %v1741_v50 = vpop.f32.mrf.mxu1 }
 0x326   : > { %v2306_v54 = vmax.f32 %v2305_v61, %v1548_v38  ;;  %v2368_v1 = vmax.f32 %v2367_v19, %v1741_v50 }
 0x327   : > { %v1550_v13 = vpop.f32.mrf.mxu0  ;;  %v1743_v32 = vpop.f32.mrf.mxu1 }
 0x328   : > { %v2276_v60 = vmax.f32 %v2275_v42, %v1550_v13  ;;  %v2338_v59 = vmax.f32 %v2337_v45, %v1743_v32 }
 0x329   : > { %v1552_v29 = vpop.f32.mrf.mxu0  ;;  %v1745_v34 = vpop.f32.mrf.mxu1 }
 0x32a   : > { %v2307_v35 = vmax.f32 %v2306_v54, %v1552_v29  ;;  %v2369_v11 = vmax.f32 %v2368_v1, %v1745_v34 }
 0x32b   : > { %v1556_v37 = vpop.f32.mrf.mxu0  ;;  %v1749_v40 = vpop.f32.mrf.mxu1  ;;  %2021 = vmatmul.mubr.bf16.gmra.mxu0 %v3709_v26  ;;  %2234 = vmatmul.mubr.bf16.gmra.mxu1 %v3729_v56 }
 0x32c   : > { %v2277_v57 = vmax.f32 %v2276_v60, %v1556_v37  ;;  %v2339_v39 = vmax.f32 %v2338_v59, %v1749_v40  ;;  %2030 = vmatprep.mubr.bf16.mxu0 %v3253_v0  ;;  %2243 = vmatprep.mubr.bf16.mxu1 %v3253_v0 }
 0x32d   : > { %v1558_v43 = vpop.f32.mrf.mxu0  ;;  %v1751_v46 = vpop.f32.mrf.mxu1 }
 0x32e   : > { %v2308_v47 = vmax.f32 %v2307_v35, %v1558_v43  ;;  %v2370_v4 = vmax.f32 %v2369_v11, %v1751_v46 }
 0x32f   : > { %v1560_v25 = vpop.f32.mrf.mxu0  ;;  %v1753_v52 = vpop.f32.mrf.mxu1 }
 0x330   : > { %v2278_v44 = vmax.f32 %v2277_v57, %v1560_v25  ;;  %v2340_v53 = vmax.f32 %v2339_v39, %v1753_v52 }
 0x331   : > { %v1562_v58 = vpop.f32.mrf.mxu0  ;;  %v1755_v62 = vpop.f32.mrf.mxu1 }
 0x332   : > { %v2309_v3 = vmax.f32 %v2308_v47, %v1562_v58  ;;  %v2371_v26 = vmax.f32 %v2370_v4, %v1755_v62 }
 0x333   : > { %v1566_v5 = vpop.f32.mrf.mxu0  ;;  %v1759_v6 = vpop.f32.mrf.mxu1  ;;  %2031 = vmatmul.mubr.bf16.gmra.mxu0 %v3717_v41  ;;  %2244 = vmatmul.mubr.bf16.gmra.mxu1 %v3737_v7 }
 0x334   : > { %v2279_v9 = vmax.f32 %v2278_v44, %v1566_v5  ;;  %v2341_v12 = vmax.f32 %v2340_v53, %v1759_v6  ;;  %2040 = vmatprep.mubr.bf16.mxu0 %v3253_v0  ;;  %2253 = vmatprep.mubr.bf16.mxu1 %v3253_v0 }
 0x335   : > { %v1568_v8 = vpop.f32.mrf.mxu0  ;;  %v1761_v15 = vpop.f32.mrf.mxu1 }
 0x336   : > { %v2310_v17 = vmax.f32 %v2309_v3, %v1568_v8  ;;  %v2372_v18 = vmax.f32 %v2371_v26, %v1761_v15 }
 0x337   : > { %v1570_v2 = vpop.f32.mrf.mxu0  ;;  %v1763_v20 = vpop.f32.mrf.mxu1 }
 0x338   : > { %v2280_v23 = vmax.f32 %v2279_v9, %v1570_v2  ;;  %v2342_v24 = vmax.f32 %v2341_v12, %v1763_v20 }
 0x339   : > { %v1572_v10 = vpop.f32.mrf.mxu0  ;;  %v1765_v14 = vpop.f32.mrf.mxu1 }
 0x33a   : > { %v2311_v31 = vmax.f32 %v2310_v17, %v1572_v10  ;;  %v2373_v41 = vmax.f32 %v2372_v18, %v1765_v14 }
 0x33b   : > { %v1576_v33 = vpop.f32.mrf.mxu0  ;;  %v1769_v36 = vpop.f32.mrf.mxu1  ;;  %2041 = vmatmul.mubr.bf16.gmra.mxu0 %v3729_v56  ;;  %2254 = vmatmul.mubr.bf16.gmra.mxu1 %v3749_v21 }
 0x33c   : > { %v2281_v49 = vmax.f32 %v2280_v23, %v1576_v33  ;;  %v2343_v51 = vmax.f32 %v2342_v24, %v1769_v36  ;;  %2050 = vmatprep.mubr.bf16.mxu0 %v3253_v0  ;;  %2263 = vmatprep.mubr.bf16.mxu1 %v3253_v0 }
 0x33d   : > { %v1578_v55 = vpop.f32.mrf.mxu0  ;;  %v1771_v63 = vpop.f32.mrf.mxu1 }
 0x33e   : > { %v2312_v16 = vmax.f32 %v2311_v31, %v1578_v55  ;;  %v2374_v61 = vmax.f32 %v2373_v41, %v1771_v63 }
 0x33f   : > { %v1580_v19 = vpop.f32.mrf.mxu0  ;;  %v1773_v22 = vpop.f32.mrf.mxu1 }
 0x340   : > { %v2282_v30 = vmax.f32 %v2281_v49, %v1580_v19  ;;  %v2344_v42 = vmax.f32 %v2343_v51, %v1773_v22 }
 0x341   : > { %v1582_v45 = vpop.f32.mrf.mxu0  ;;  %v1775_v38 = vpop.f32.mrf.mxu1 }
 0x342   : > { %v2313_v50 = vmax.f32 %v2312_v16, %v1582_v45  ;;  %v2375_v56 = vmax.f32 %v2374_v61, %v1775_v38 }
 0x343   : > { %v1586_v54 = vpop.f32.mrf.mxu0  ;;  %v1779_v1 = vpop.f32.mrf.mxu1  ;;  %2051 = vmatmul.mubr.bf16.gmra.mxu0 %v3737_v7  ;;  %2264 = vmatmul.mubr.bf16.gmra.mxu1 %v3755_v28 }
 0x344   : > { %v2283_v13 = vmax.f32 %v2282_v30, %v1586_v54  ;;  %v2345_v32 = vmax.f32 %v2344_v42, %v1779_v1  ;;  %2060 = vmatprep.mubr.bf16.mxu0 %v3253_v0 }
 0x345   : > { %v1588_v60 = vpop.f32.mrf.mxu0  ;;  %v1781_v59 = vpop.f32.mrf.mxu1 }
 0x346   : > { %v2314_v29 = vmax.f32 %v2313_v50, %v1588_v60  ;;  %v2376_v34 = vmax.f32 %v2375_v56, %v1781_v59 }
 0x347   : > { %v1590_v35 = vpop.f32.mrf.mxu0  ;;  %v1783_v11 = vpop.f32.mrf.mxu1 }
 0x348   : > { %v2284_v37 = vmax.f32 %v2283_v13, %v1590_v35  ;;  %v2346_v40 = vmax.f32 %v2345_v32, %v1783_v11 }
 0x349   : > { %v1592_v57 = vpop.f32.mrf.mxu0  ;;  %v1785_v39 = vpop.f32.mrf.mxu1 }
 0x34a   : > { %v2315_v43 = vmax.f32 %v2314_v29, %v1592_v57  ;;  %v2377_v46 = vmax.f32 %v2376_v34, %v1785_v39 }
 0x34b   : > { %v1596_v47 = vpop.f32.mrf.mxu0  ;;  %v1789_v7 = vpop.f32.mrf.mxu1  ;;  %2061 = vmatmul.mubr.bf16.gmra.mxu0 %v3749_v21 }
 0x34c   : > { %v2285_v4 = vmax.f32 %v2284_v37, %v1596_v47  ;;  %v2347_v25 = vmax.f32 %v2346_v40, %v1789_v7  ;;  %2070 = vmatprep.mubr.bf16.mxu0 %v3253_v0 }
 0x34d   : > { %v1598_v52 = vpop.f32.mrf.mxu0  ;;  %v1791_v44 = vpop.f32.mrf.mxu1 }
 0x34e   : > { %v2316_v53 = vmax.f32 %v2315_v43, %v1598_v52  ;;  %v2378_v58 = vmax.f32 %v2377_v46, %v1791_v44 }
 0x34f   : > { %v1600_v62 = vpop.f32.mrf.mxu0  ;;  %v1793_v3 = vpop.f32.mrf.mxu1 }
 0x350   : > { %v2286_v26 = vmax.f32 %v2285_v4, %v1600_v62  ;;  %v2348_v5 = vmax.f32 %v2347_v25, %v1793_v3 }
 0x351   : > { %v1602_v6 = vpop.f32.mrf.mxu0  ;;  %v1795_v9 = vpop.f32.mrf.mxu1 }
 0x352   : > { %v2317_v12 = vmax.f32 %v2316_v53, %v1602_v6  ;;  %v2379_v8 = vmax.f32 %v2378_v58, %v1795_v9 }
 0x353   : > { %v1606_v15 = vpop.f32.mrf.mxu0  ;;  %v1799_v17 = vpop.f32.mrf.mxu1  ;;  %2071 = vmatmul.mubr.bf16.gmra.mxu0 %v3755_v28 }
 0x354   : > { %v2287_v21 = vmax.f32 %v2286_v26, %v1606_v15  ;;  %v2349_v18 = vmax.f32 %v2348_v5, %v1799_v17  ;;  %2113 = vmatprep.mubr.bf16.mxu0 %v3253_v0 }
 0x355   : > { %v1608_v2 = vpop.f32.mrf.mxu0  ;;  %v1801_v20 = vpop.f32.mrf.mxu1 }
 0x356   : > { %v2318_v23 = vmax.f32 %v2317_v12, %v1608_v2  ;;  %v2380_v24 = vmax.f32 %v2379_v8, %v1801_v20 }
 0x357   : > { %v1610_v10 = vpop.f32.mrf.mxu0  ;;  %v1803_v14 = vpop.f32.mrf.mxu1 }
 0x358   : > { %v2288_v31 = vmax.f32 %v2287_v21, %v1610_v10  ;;  %v2350_v41 = vmax.f32 %v2349_v18, %v1803_v14 }
 0x359   : > { %v1612_v33 = vpop.f32.mrf.mxu0  ;;  %v1805_v36 = vpop.f32.mrf.mxu1 }
 0x35a   : > { %v2319_v49 = vmax.f32 %v2318_v23, %v1612_v33  ;;  %v2381_v51 = vmax.f32 %v2380_v24, %v1805_v36 }
 0x35b   : > { %v1616_v55 = vpop.f32.mrf.mxu0  ;;  %v1809_v63 = vpop.f32.mrf.mxu1  ;;  %2114 = vmatmul.mubr.bf16.vlgmr.msra.gmra.mxu0 %v3562_v27 }
 0x35c   : > { %v2289_v28 = vmax.f32 %v2288_v31, %v1616_v55  ;;  %v2351_v16 = vmax.f32 %v2350_v41, %v1809_v63  ;;  %2123 = vmatprep.mubr.bf16.mxu0 %v3253_v0 }
 0x35d   : > { %v1618_v61 = vpop.f32.mrf.mxu0  ;;  %v1811_v19 = vpop.f32.mrf.mxu1 }
 0x35e   : > { %v2320_v22 = vmax.f32 %v2319_v49, %v1618_v61  ;;  %v2382_v30 = vmax.f32 %v2381_v51, %v1811_v19 }
 0x35f   : > { %v1620_v42 = vpop.f32.mrf.mxu0  ;;  %v1813_v45 = vpop.f32.mrf.mxu1 }
 0x360   : > { %v2290_v38 = vmax.f32 %v2289_v28, %v1620_v42  ;;  %v2352_v50 = vmax.f32 %v2351_v16, %v1813_v45 }
 0x361   : > { %v1622_v56 = vpop.f32.mrf.mxu0  ;;  %v1815_v54 = vpop.f32.mrf.mxu1 }
 0x362   : > { %v2321_v1 = vmax.f32 %v2320_v22, %v1622_v56  ;;  %v2383_v13 = vmax.f32 %v2382_v30, %v1815_v54 }
 0x363   : > { %v1626_v32 = vpop.f32.mrf.mxu0  ;;  %v1819_v60 = vpop.f32.mrf.mxu1  ;;  %2124 = vmatmul.mubr.bf16.gmra.mxu0 %v3578_v48 }
 0x364   : > { %v2291_v27 = vmax.f32 %v2290_v38, %v1626_v32  ;;  %v2353_v59 = vmax.f32 %v2352_v50, %v1819_v60 }
 0x365   : > { %v1628_v29 = vpop.f32.mrf.mxu0  ;;  %v1821_v0 = vpop.f32.mrf.mxu1 }
 0x366   : > { %v2322_v34 = vmax.f32 %v2321_v1, %v1628_v29  ;;  %v2384_v35 = vmax.f32 %v2383_v13, %v1821_v0 }
 0x367   : > { %v1630_v11 = vpop.f32.mrf.mxu0  ;;  %v1823_v37 = vpop.f32.mrf.mxu1 }
 0x368   : > { %v2292_v40 = vmax.f32 %v2291_v27, %v1630_v11  ;;  %v2354_v57 = vmax.f32 %v2353_v59, %v1823_v37 }
 0x369   : > { %v1632_v39 = vpop.f32.mrf.mxu0  ;;  %v1825_v43 = vpop.f32.mrf.mxu1 }
 0x36a   : > { %v2323_v46 = vmax.f32 %v2322_v34, %v1632_v39  ;;  %v2385_v47 = vmax.f32 %v2384_v35, %v1825_v43 }
 0x36b   : > { %v1636_v7 = vpop.f32.mrf.mxu0  ;;  %v1829_v4 = vpop.f32.mrf.mxu1 }
 0x36c   : > { %v2293_v25 = vmax.f32 %v2292_v40, %v1636_v7  ;;  %v2355_v52 = vmax.f32 %v2354_v57, %v1829_v4 }
 0x36d   : > { %v1638_v44 = vpop.f32.mrf.mxu0  ;;  %v1831_v48 = vpop.f32.mrf.mxu1 }
 0x36e   : > { %v2324_v53 = vmax.f32 %v2323_v46, %v1638_v44  ;;  %v2386_v58 = vmax.f32 %v2385_v47, %v1831_v48 }
 0x36f   : > { %v1640_v62 = vpop.f32.mrf.mxu0  ;;  %v1833_v3 = vpop.f32.mrf.mxu1 }
 0x370   : > { %v2294_v26 = vmax.f32 %v2293_v25, %v1640_v62  ;;  %v2356_v5 = vmax.f32 %v2355_v52, %v1833_v3 }
 0x371   : > { %v1642_v6 = vpop.f32.mrf.mxu0  ;;  %v1835_v9 = vpop.f32.mrf.mxu1 }
 0x372   : > { %v2325_v12 = vmax.f32 %v2324_v53, %v1642_v6  ;;  %v2387_v8 = vmax.f32 %v2386_v58, %v1835_v9 }
 0x373   : > { %v1646_v15 = vpop.f32.mrf.mxu0  ;;  %v1839_v17 = vpop.f32.mrf.mxu1 }
 0x374   : > { %v2295_v21 = vmax.f32 %v2294_v26, %v1646_v15  ;;  %v2357_v18 = vmax.f32 %v2356_v5, %v1839_v17 }
 0x375   : > { %v1648_v2 = vpop.f32.mrf.mxu0  ;;  %v1841_v20 = vpop.f32.mrf.mxu1 }
 0x376   : > { %v2326_v23 = vmax.f32 %v2325_v12, %v1648_v2  ;;  %v2388_v24 = vmax.f32 %v2387_v8, %v1841_v20 }
 0x377   : > { %v1650_v10 = vpop.f32.mrf.mxu0  ;;  %v1843_v14 = vpop.f32.mrf.mxu1 }
 0x378   : > { %v2296_v31 = vmax.f32 %v2295_v21, %v1650_v10  ;;  %v2358_v41 = vmax.f32 %v2357_v18, %v1843_v14  ;;  %v2607_v21 = vlaneseq }
 0x379   : > { %v1652_v33 = vpop.f32.mrf.mxu0  ;;  %v1845_v36 = vpop.f32.mrf.mxu1 }
 0x37a   : > { %v2327_v49 = vmax.f32 %v2326_v23, %v1652_v33  ;;  %v2389_v51 = vmax.f32 %v2388_v24, %v1845_v36 }
 0x37b   : > { %v1656_v55 = vpop.f32.mrf.mxu0  ;;  %v1849_v63 = vpop.f32.mrf.mxu1 }
 0x37c   : > { %v2297_v28 = vmax.f32 %v2296_v31, %v1656_v55  ;;  %v2359_v16 = vmax.f32 %v2358_v41, %v1849_v63  ;;  %v3838_v31 = vshrl.u32 %v2607_v21, 7 }
 0x37d   : > { %v1658_v61 = vpop.f32.mrf.mxu0  ;;  %v1851_v19 = vpop.f32.mrf.mxu1 }
 0x37e   : > { %v2328_v22 = vmax.f32 %v2327_v49, %v1658_v61  ;;  %v2390_v30 = vmax.f32 %v2389_v51, %v1851_v19  ;;  %4107 = vst [vmem:[#allocation9_spill] sm:$0xff] %v3838_v31  ;;  %v2609_v61 = vsub.s32 0, %v3838_v31 }
 0x37f   : > { %v1660_v42 = vpop.f32.mrf.mxu0  ;;  %v1853_v45 = vpop.f32.mrf.mxu1 }
 0x380   : > { %v2298_v38 = vmax.f32 %v2297_v28, %v1660_v42  ;;  %v2360_v50 = vmax.f32 %v2359_v16, %v1853_v45  ;;  %v3846_v42 = vld [vmem:[%s4086_s8] sm:$0xff] }
 0x381   : > { %v1662_v56 = vpop.f32.mrf.mxu0  ;;  %v1855_v54 = vpop.f32.mrf.mxu1  ;;  %4108 = vst [vmem:[#allocation10_spill] sm:$0xff] %v3846_v42 }
 0x382   : > { %v2329_v1 = vmax.f32 %v2328_v22, %v1662_v56  ;;  %v2391_v13 = vmax.f32 %v2390_v30, %v1855_v54  ;;  %v2617_v56 = vsub.s32 2, %v3838_v31 }
 0x383   : > { %v1666_v32 = vpop.f32.mrf.mxu0  ;;  %v1859_v60 = vpop.f32.mrf.mxu1 }
 0x384   : > { %v2299_v27 = vmax.f32 %v2298_v38, %v1666_v32  ;;  %v2361_v59 = vmax.f32 %v2360_v50, %v1859_v60  ;;  %v3854_v32 = vld [vmem:[%s4087_s9] sm:$0xff] }
 0x385   : > { %v1668_v29 = vpop.f32.mrf.mxu0  ;;  %v1861_v0 = vpop.f32.mrf.mxu1  ;;  %4109 = vst [vmem:[#allocation11_spill] sm:$0xff] %v3854_v32 }
 0x386   : > { %v2330_v34 = vmax.f32 %v2329_v1, %v1668_v29  ;;  %v2392_v35 = vmax.f32 %v2391_v13, %v1861_v0  ;;  %v2610_v29 = vrot.slane %v3846_v42, %v2609_v61  ;;  %v2613_v0 = vsub.s32 1, %v3838_v31 }
 0x387   : > { %v1670_v11 = vpop.f32.mrf.mxu0  ;;  %v1863_v37 = vpop.f32.mrf.mxu1 }
 0x388   : > { %v2300_v40 = vmax.f32 %v2299_v27, %v1670_v11  ;;  %v2362_v57 = vmax.f32 %v2361_v59, %v1863_v37  ;;  %v2664_v21 = vrot.slane %v3854_v32, %v2613_v0 }
 0x389   : > { %v1672_v39 = vpop.f32.mrf.mxu0  ;;  %v1865_v43 = vpop.f32.mrf.mxu1 }
 0x38a   : > { %v2331_v46 = vmax.f32 %v2330_v34, %v1672_v39  ;;  %v2393_v47 = vmax.f32 %v2392_v35, %v1865_v43  ;;  %v2621_v34 = vsub.s32 3, %v3838_v31  ;;  %v2660_v43 = vrot.slane %v3854_v32, %v2609_v61 }
 0x38b   : > { %v1676_v7 = vpop.f32.mrf.mxu0  ;;  %v1869_v4 = vpop.f32.mrf.mxu1 }
 0x38c   : > { %v2301_v25 = vmax.f32 %v2300_v40, %v1676_v7  ;;  %v2363_v52 = vmax.f32 %v2362_v57, %v1869_v4 }
 0x38d   : > { %v1678_v44 = vpop.f32.mrf.mxu0  ;;  %v1871_v48 = vpop.f32.mrf.mxu1 }
 0x38e   : > { %v2332_v53 = vmax.f32 %v2331_v46, %v1678_v44  ;;  %v2394_v58 = vmax.f32 %v2393_v47, %v1871_v48  ;;  %v2618_v46 = vrot.slane %v3846_v42, %v2617_v56  ;;  %v3255_v47 = vmov 1966171168  }
 0x38f   : > { %v1680_v62 = vpop.f32.mrf.mxu0  ;;  %v1873_v3 = vpop.f32.mrf.mxu1  ;;  %v2718_v7 = vunpack.c.l.s4 %v3255_v47 }
 0x390   : > { %v2302_v26 = vmax.f32 %v2301_v25, %v1680_v62  ;;  %v2364_v5 = vmax.f32 %v2363_v52, %v1873_v3  ;;  %v2668_v62 = vrot.slane %v3854_v32, %v2617_v56  ;;  %v2614_v3 = vrot.slane %v3846_v42, %v2613_v0 }
 0x391   : > { %v1682_v6 = vpop.f32.mrf.mxu0  ;;  %v1875_v9 = vpop.f32.mrf.mxu1 }
 0x392   : > { %v2333_v12 = vmax.f32 %v2332_v53, %v1682_v6  ;;  %v2395_v8 = vmax.f32 %v2394_v58, %v1875_v9 }
 0x393   : > { %v1686_v15 = vpop.f32.mrf.mxu0  ;;  %v1879_v17 = vpop.f32.mrf.mxu1 }
 0x394   : > { %v2303_v18 = vmax.f32 %v2302_v26, %v1686_v15  ;;  %v2365_v2 = vmax.f32 %v2364_v5, %v1879_v17  ;;  %v2622_v26 = vrot.slane %v3846_v42, %v2621_v34 }
 0x395   : > { %v1688_v20 = vpop.f32.mrf.mxu0  ;;  %v1881_v23 = vpop.f32.mrf.mxu1 }
 0x396   : > { %v2334_v24 = vmax.f32 %v2333_v12, %v1688_v20  ;;  %v2396_v10 = vmax.f32 %v2395_v8, %v1881_v23 }
 0x397   : > { %v1690_v14 = vpop.f32.mrf.mxu0  ;;  %v1883_v41 = vpop.f32.mrf.mxu1 }
 0x398   : > { %v2304_v33 = vmax.f32 %v2303_v18, %v1690_v14  ;;  %v2366_v36 = vmax.f32 %v2365_v2, %v1883_v41  ;;  %v2719_v18 = vunpack.c.0.s8 %v2718_v7  ;;  %v2672_v2 = vrot.slane %v3854_v32, %v2621_v34 }
 0x399   : > { %v1692_v49 = vpop.f32.mrf.mxu0  ;;  %v1885_v51 = vpop.f32.mrf.mxu1 }
 0x39a   : > { %v2557_v55 = vrot.slane %v2304_v33, 4  ;;  %v2569_v63 = vrot.slane %v2366_v36, 4  ;;  %v2335_v28 = vmax.f32 %v2334_v24, %v1692_v49  ;;  %v2397_v16 = vmax.f32 %v2396_v10, %v1885_v51 }
 0x39b   : > { %v1922_v19 = vpop.f32.mrf.mxu0  ;;  %v3841_v22 = vpop.f32.mrf.mxu1 }
 0x39c   : > { %v2558_v30 = vmax.f32 %v2304_v33, %v2557_v55  ;;  %v2570_v45 = vmax.f32 %v2366_v36, %v2569_v63  ;;  %v2563_v38 = vrot.slane %v2335_v28, 4  ;;  %v2575_v50 = vrot.slane %v2397_v16, 4 }
 0x39d   : > { %v1924_v54 = vpop.f32.mrf.mxu0  ;;  %v3849_v1 = vpop.f32.mrf.mxu1 }
 0x39e   : > { %v2559_v13 = vrot.slane %v2558_v30, 2  ;;  %v2571_v60 = vrot.slane %v2570_v45, 2  ;;  %v2564_v27 = vmax.f32 %v2335_v28, %v2563_v38  ;;  %v2576_v59 = vmax.f32 %v2397_v16, %v2575_v50 }
 0x39f   : > { %v1926_v35 = vpop.f32.mrf.mxu0  ;;  %v3859_v11 = vpop.f32.mrf.mxu1  ;;  %v3877_v16 = vsub.s32 %v2719_v18, %v3838_v31 }
 0x3a0   : > { %v2560_v37 = vmax.f32 %v2558_v30, %v2559_v13  ;;  %v2572_v40 = vmax.f32 %v2570_v45, %v2571_v60  ;;  %v2565_v57 = vrot.slane %v2564_v27, 2  ;;  %v2577_v39 = vrot.slane %v2576_v59, 2 }
 0x3a1   : > { %v2398_v4 = vmax.f32 %v1922_v19, %v1926_v35  ;;  %v1928_v25 = vpop.f32.mrf.mxu0  ;;  %v3863_v52 = vpop.f32.mrf.mxu1  ;;  %4110 = vst [vmem:[#allocation12_spill] sm:$0xff] %v3877_v16 }
 0x3a2   : > { %v2561_v44 = vrot.slane %v2560_v37, 1  ;;  %v2573_v48 = vrot.slane %v2572_v40, 1  ;;  %v2566_v53 = vmax.f32 %v2564_v27, %v2565_v57  ;;  %v2578_v58 = vmax.f32 %v2576_v59, %v2577_v39 }
 0x3a3   : > { %v2429_v5 = vmax.f32 %v1924_v54, %v1928_v25  ;;  %v1932_v6 = vpop.f32.mrf.mxu0  ;;  %v3868_v9 = vpop.f32.mrf.mxu1 }
 0x3a4   : > { %v2562_v12 = vmax.f32 %v2560_v37, %v2561_v44  ;;  %v2574_v8 = vmax.f32 %v2572_v40, %v2573_v48  ;;  %v2567_v15 = vrot.slane %v2566_v53, 1  ;;  %v2579_v17 = vrot.slane %v2578_v58, 1 }
 0x3a5   : > { %v2399_v20 = vmax.f32 %v2398_v4, %v1932_v6  ;;  %v1934_v23 = vpop.f32.mrf.mxu0  ;;  %v3872_v24 = vpop.f32.mrf.mxu1 }
 0x3a6   : > { %v2647_v10 = vmul.f32 %v2610_v29, %v2562_v12  ;;  %v2649_v14 = vmul.f32 %v2618_v46, %v2574_v8  ;;  %v2568_v41 = vmax.f32 %v2566_v53, %v2567_v15  ;;  %v2580_v33 = vmax.f32 %v2578_v58, %v2579_v17 }
 0x3a7   : > { %v2430_v36 = vmax.f32 %v2429_v5, %v1934_v23  ;;  %v1936_v49 = vpop.f32.mrf.mxu0  ;;  %v3874_v51 = vpop.f32.mrf.mxu1 }
 0x3a8   : > { %v2648_v55 = vmul.f32 %v2614_v3, %v2568_v41  ;;  %v2650_v63 = vmul.f32 %v2622_v26, %v2580_v33  ;;  %v2697_v28 = vadd.f32 %v2660_v43, %v2647_v10  ;;  %v2400_v61 = vmax.f32 %v2399_v20, %v1936_v49 }
 0x3a9   : > { %v1938_v19 = vpop.f32.mrf.mxu0  ;;  %v3879_v30 = vpop.f32.mrf.mxu1  ;;  %v2699_v45 = vadd.f32 %v2668_v62, %v2649_v14 }
 0x3aa   : > { %v2698_v38 = vadd.f32 %v2664_v21, %v2648_v55  ;;  %v2700_v50 = vadd.f32 %v2672_v2, %v2650_v63  ;;  %v2431_v56 = vmax.f32 %v2430_v36, %v1938_v19 }
 0x3ab   : > { %v1942_v54 = vpop.f32.mrf.mxu0  ;;  %v3881_v13 = vpop.f32.mrf.mxu1 }
 0x3ac   : > { %v2713_v60 = vcombine.low %v2697_v28, %v2698_v38  ;;  %v2714_v27 = vcombine.low %v2699_v45, %v2700_v50  ;;  %v2401_v59 = vmax.f32 %v2400_v61, %v1942_v54 }
 0x3ad   : > { %v1944_v29 = vpop.f32.mrf.mxu0  ;;  %v3883_v0 = vpop.f32.mrf.mxu1 }
 0x3ae   : > { %v3886_v34 = vrot.slane %v2713_v60, %v3877_v16  ;;  %v3889_v35 = vrot.slane %v2714_v27, %v3877_v16  ;;  %v2432_v37 = vmax.f32 %v2431_v56, %v1944_v29 }
 0x3af   : > { %v1946_v40 = vpop.f32.mrf.mxu0  ;;  %v3891_v57 = vpop.f32.mrf.mxu1 }
 0x3b0   : > { %4111 = vst [vmem:[#allocation13_spill] sm:$0xff] %v3886_v34  ;;  %4112 = vst [vmem:[#allocation14_spill] sm:$0xff] %v3889_v35  ;;  %v2402_v39 = vmax.f32 %v2401_v59, %v1946_v40 }
 0x3b1   : > { %v1948_v46 = vpop.f32.mrf.mxu0  ;;  %v3895_v47 = vpop.f32.mrf.mxu1 }
 0x3b2   : > { %v2433_v7 = vmax.f32 %v2432_v37, %v1948_v46 }
 0x3b3   : > { %v1952_v4 = vpop.f32.mrf.mxu0  ;;  %v3897_v25 = vpop.f32.mrf.mxu1 }
 0x3b4   : > { %v2403_v44 = vmax.f32 %v2402_v39, %v1952_v4 }
 0x3b5   : > { %v1954_v48 = vpop.f32.mrf.mxu0  ;;  %v3899_v53 = vpop.f32.mrf.mxu1 }
 0x3b6   : > { %v2434_v58 = vmax.f32 %v2433_v7, %v1954_v48 }
 0x3b7   : > { %v1956_v62 = vpop.f32.mrf.mxu0  ;;  %v3901_v3 = vpop.f32.mrf.mxu1 }
 0x3b8   : > { %v2404_v26 = vmax.f32 %v2403_v44, %v1956_v62 }
 0x3b9   : > { %v1958_v5 = vpop.f32.mrf.mxu0  ;;  %v3903_v6 = vpop.f32.mrf.mxu1 }
 0x3ba   : > { %v2435_v12 = vmax.f32 %v2434_v58, %v1958_v5 }
 0x3bb   : > { %v1962_v8 = vpop.f32.mrf.mxu0  ;;  %v3905_v15 = vpop.f32.mrf.mxu1 }
 0x3bc   : > { %v2405_v17 = vmax.f32 %v2404_v26, %v1962_v8 }
 0x3bd   : > { %v1964_v21 = vpop.f32.mrf.mxu0  ;;  %v3907_v18 = vpop.f32.mrf.mxu1 }
 0x3be   : > { %v2436_v2 = vmax.f32 %v2435_v12, %v1964_v21 }
 0x3bf   : > { %v1966_v20 = vpop.f32.mrf.mxu0  ;;  %v3909_v23 = vpop.f32.mrf.mxu1 }
 0x3c0   : > { %v2406_v10 = vmax.f32 %v2405_v17, %v1966_v20 }
 0x3c1   : > { %v1968_v14 = vpop.f32.mrf.mxu0  ;;  %v3911_v41 = vpop.f32.mrf.mxu1 }
 0x3c3   : > { %v1972_v33 = vpop.f32.mrf.mxu0  ;;  %v3913_v36 = vpop.f32.mrf.mxu1 }
 0x3c5   : > { %v1974_v49 = vpop.f32.mrf.mxu0  ;;  %v3915_v55 = vpop.f32.mrf.mxu1 }
 0x3c7   : > { %v1976_v63 = vpop.f32.mrf.mxu0  ;;  %v3917_v28 = vpop.f32.mrf.mxu1 }
 0x3c9   : > { %v1978_v61 = vpop.f32.mrf.mxu0  ;;  %v3919_v19 = vpop.f32.mrf.mxu1 }
 0x3cb   : > { %v1982_v45 = vpop.f32.mrf.mxu0  ;;  %v3921_v38 = vpop.f32.mrf.mxu1 }
 0x3cc   : > { %4113 = vst [vmem:[#allocation15_spill] sm:$0xff] %v3921_v38 }
 0x3cd   : > { %v1984_v50 = vpop.f32.mrf.mxu0  ;;  %v3923_v56 = vpop.f32.mrf.mxu1 }
 0x3ce   : > { %4114 = vst [vmem:[#allocation16_spill] sm:$0xff] %v3923_v56 }
 0x3cf   : > { %v1986_v54 = vpop.f32.mrf.mxu0  ;;  %v3925_v60 = vpop.f32.mrf.mxu1 }
 0x3d0   : > { %4115 = vst [vmem:[#allocation17_spill] sm:$0xff] %v3925_v60 }
 0x3d1   : > { %v1988_v27 = vpop.f32.mrf.mxu0  ;;  %v3927_v59 = vpop.f32.mrf.mxu1 }
 0x3d2   : > { %4116 = vst [vmem:[#allocation18_spill] sm:$0xff] %v3927_v59 }
 0x3d3   : > { %v1992_v29 = vpop.f32.mrf.mxu0  ;;  %v3929_v37 = vpop.f32.mrf.mxu1 }
 0x3d4   : > { %4117 = vst [vmem:[#allocation19_spill] sm:$0xff] %v3929_v37 }
 0x3d5   : > { %v1994_v40 = vpop.f32.mrf.mxu0  ;;  %v3931_v39 = vpop.f32.mrf.mxu1 }
 0x3d6   : > { %4118 = vst [vmem:[#allocation20_spill] sm:$0xff] %v3931_v39 }
 0x3d7   : > { %v1996_v46 = vpop.f32.mrf.mxu0  ;;  %v3933_v7 = vpop.f32.mrf.mxu1 }
 0x3d8   : > { %4119 = vst [vmem:[#allocation21_spill] sm:$0xff] %v3933_v7 }
 0x3d9   : > { %v1998_v4 = vpop.f32.mrf.mxu0  ;;  %v3935_v44 = vpop.f32.mrf.mxu1 }
 0x3da   : > { %4120 = vst [vmem:[#allocation22_spill] sm:$0xff] %v3935_v44  ;;  %v2407_v44 = vmax.f32 %v2406_v10, %v1972_v33 }
 0x3db   : > { %v2002_v48 = vpop.f32.mrf.mxu0  ;;  %v3937_v58 = vpop.f32.mrf.mxu1 }
 0x3dc   : > { %4121 = vst [vmem:[#allocation23_spill] sm:$0xff] %v3937_v58 }
 0x3dd   : > { %v2004_v62 = vpop.f32.mrf.mxu0  ;;  %v3939_v26 = vpop.f32.mrf.mxu1 }
 0x3de   : > { %4122 = vst [vmem:[#allocation24_spill] sm:$0xff] %v3939_v26 }
 0x3df   : > { %v2006_v5 = vpop.f32.mrf.mxu0  ;;  %v3941_v12 = vpop.f32.mrf.mxu1 }
 0x3e0   : > { %4123 = vst [vmem:[#allocation25_spill] sm:$0xff] %v3941_v12  ;;  %v2437_v12 = vmax.f32 %v2436_v2, %v1968_v14  ;;  %v2494_v2 = vmax.f32 %v3863_v52, %v3849_v1 }
 0x3e1   : > { %v2008_v8 = vpop.f32.mrf.mxu0  ;;  %v3943_v17 = vpop.f32.mrf.mxu1 }
 0x3e2   : > { %4124 = vst [vmem:[#allocation26_spill] sm:$0xff] %v3943_v17  ;;  %v2438_v39 = vmax.f32 %v2437_v12, %v1974_v49 }
 0x3e3   : > { %v2012_v21 = vpop.f32.mrf.mxu0  ;;  %v3945_v20 = vpop.f32.mrf.mxu1 }
 0x3e4   : > { %4125 = vst [vmem:[#allocation27_spill] sm:$0xff] %v3945_v20  ;;  %v2408_v20 = vmax.f32 %v2407_v44, %v1976_v63  ;;  %v2439_v59 = vmax.f32 %v2438_v39, %v1978_v61  ;;  %v2495_v61 = vmax.f32 %v2494_v2, %v3872_v24 }
 0x3e5   : > { %v2014_v43 = vpop.f32.mrf.mxu0  ;;  %v3947_v35 = vpop.f32.mrf.mxu1 }
 0x3e6   : > { %4126 = vst [vmem:[#allocation28_spill] sm:$0xff] %v3947_v35  ;;  %v2409_v35 = vmax.f32 %v2408_v20, %v1982_v45  ;;  %v2440_v56 = vmax.f32 %v2439_v59, %v1984_v50 }
 0x3e7   : > { %v2016_v34 = vpop.f32.mrf.mxu0  ;;  %v3949_v16 = vpop.f32.mrf.mxu1 }
 0x3e8   : > { %4127 = vst [vmem:[#allocation29_spill] sm:$0xff] %v3949_v16  ;;  %v2463_v16 = vmax.f32 %v3859_v11, %v3841_v22  ;;  %v2410_v38 = vmax.f32 %v2409_v35, %v1986_v54  ;;  %v2441_v33 = vmax.f32 %v2440_v56, %v1988_v27  ;;  %v2496_v11 = vmax.f32 %v2495_v61, %v3879_v30 }
 0x3e9   : > { %v2018_v32 = vpop.f32.mrf.mxu0  ;;  %v3951_v42 = vpop.f32.mrf.mxu1 }
 0x3ea   : > { %4128 = vst [vmem:[#allocation30_spill] sm:$0xff] %v3951_v42  ;;  %v2464_v10 = vmax.f32 %v2463_v16, %v3868_v9  ;;  %v2411_v49 = vmax.f32 %v2410_v38, %v1992_v29  ;;  %v2442_v44 = vmax.f32 %v2441_v33, %v1994_v40  ;;  %v2497_v16 = vmax.f32 %v2496_v11, %v3883_v0 }
 0x3eb   : > { %v2022_v31 = vpop.f32.mrf.mxu0  ;;  %v3953_v26 = vpop.f32.mrf.mxu1 }
 0x3ec   : > { %v2465_v45 = vmax.f32 %v2464_v10, %v3874_v51  ;;  %v2412_v22 = vmax.f32 %v2411_v49, %v1996_v46  ;;  %v2443_v1 = vmax.f32 %v2442_v44, %v1998_v4  ;;  %v2498_v51 = vmax.f32 %v2497_v16, %v3895_v47  ;;  %v4131_v44 = vld [vmem:[#allocation17_spill] sm:$0xff] }
 0x3ed   : > { %v2024_v58 = vpop.f32.mrf.mxu0  ;;  %v3955_v7 = vpop.f32.mrf.mxu1 }
 0x3ee   : > { %v2466_v35 = vmax.f32 %v2465_v45, %v3881_v13  ;;  %v2413_v52 = vmax.f32 %v2412_v22, %v2002_v48  ;;  %v2444_v24 = vmax.f32 %v2443_v1, %v2004_v62  ;;  %v2499_v40 = vmax.f32 %v2498_v51, %v3899_v53 }
 0x3ef   : > { %v2026_v17 = vpop.f32.mrf.mxu0  ;;  %v3957_v60 = vpop.f32.mrf.mxu1 }
 0x3f0   : > { %v2467_v38 = vmax.f32 %v2466_v35, %v3891_v57  ;;  %v2414_v54 = vmax.f32 %v2413_v52, %v2006_v5  ;;  %v2445_v30 = vmax.f32 %v2444_v24, %v2008_v8  ;;  %v2500_v57 = vmax.f32 %v2499_v40, %v3903_v6  ;;  %v4134_v24 = vld [vmem:[#allocation20_spill] sm:$0xff] }
 0x3f1   : > { %v2028_v37 = vpop.f32.mrf.mxu0  ;;  %v3964_v63 = vpop.f32.mrf.mxu1 }
 0x3f2   : > { %v2468_v27 = vmax.f32 %v2467_v38, %v3897_v25  ;;  %v2415_v29 = vmax.f32 %v2414_v54, %v2012_v21  ;;  %v2446_v0 = vmax.f32 %v2445_v30, %v2014_v43  ;;  %v2501_v8 = vmax.f32 %v2500_v57, %v3907_v18 }
 0x3f3   : > { %v2032_v42 = vpop.f32.mrf.mxu0  ;;  %v3970_v9 = vpop.f32.mrf.mxu1 }
 0x3f4   : > { %v2469_v46 = vmax.f32 %v2468_v27, %v3901_v3  ;;  %v2416_v48 = vmax.f32 %v2415_v29, %v2016_v34  ;;  %v2447_v47 = vmax.f32 %v2446_v0, %v2018_v32  ;;  %v2502_v3 = vmax.f32 %v2501_v8, %v3911_v41  ;;  %v4136_v29 = vld [vmem:[#allocation22_spill] sm:$0xff] }
 0x3f5   : > { %v2034_v14 = vpop.f32.mrf.mxu0  ;;  %v3976_v13 = vpop.f32.mrf.mxu1 }
 0x3f6   : > { %v2470_v62 = vmax.f32 %v2469_v46, %v3905_v15  ;;  %v2417_v12 = vmax.f32 %v2416_v48, %v2022_v31  ;;  %v2448_v53 = vmax.f32 %v2447_v47, %v2024_v58  ;;  %v2503_v31 = vmax.f32 %v2502_v3, %v3915_v55  ;;  %v4129_v58 = vld [vmem:[#allocation15_spill] sm:$0xff] }
 0x3f7   : > { %v2036_v39 = vpop.f32.mrf.mxu0  ;;  %v3982_v25 = vpop.f32.mrf.mxu1  ;;  %v4137_v46 = vld [vmem:[#allocation23_spill] sm:$0xff] }
 0x3f8   : > { %v2471_v21 = vmax.f32 %v2470_v62, %v3909_v23  ;;  %v2418_v2 = vmax.f32 %v2417_v12, %v2026_v17  ;;  %v2449_v6 = vmax.f32 %v2448_v53, %v2028_v37  ;;  %v2504_v23 = vmax.f32 %v2503_v31, %v3919_v19  ;;  %v4130_v37 = vld [vmem:[#allocation16_spill] sm:$0xff]  ;;  %v4139_v12 = vld [vmem:[#allocation25_spill] sm:$0xff]  ;;  %v4140_v53 = vld [vmem:[#allocation26_spill] sm:$0xff] }
 0x3f9   : > { %v2038_v50 = vpop.f32.mrf.mxu0  ;;  %v3988_v15 = vpop.f32.mrf.mxu1  ;;  %v4138_v62 = vld [vmem:[#allocation24_spill] sm:$0xff]  ;;  %v4141_v3 = vld [vmem:[#allocation27_spill] sm:$0xff] }
 0x3fa   : > { %v2472_v34 = vmax.f32 %v2471_v21, %v3913_v36  ;;  %v2419_v10 = vmax.f32 %v2418_v2, %v2032_v42  ;;  %v2450_v18 = vmax.f32 %v2449_v6, %v2034_v14  ;;  %v2505_v42 = vmax.f32 %v2504_v23, %v4130_v37  ;;  %v4133_v14 = vld [vmem:[#allocation19_spill] sm:$0xff] }
 0x3fb   : > { %v2042_v56 = vpop.f32.mrf.mxu0  ;;  %v3994_v36 = vpop.f32.mrf.mxu1 }
 0x3fc   : > { %v2473_v32 = vmax.f32 %v2472_v34, %v3917_v28  ;;  %v2420_v49 = vmax.f32 %v2419_v10, %v2036_v39  ;;  %v2451_v41 = vmax.f32 %v2450_v18, %v2038_v50  ;;  %v4132_v28 = vld [vmem:[#allocation18_spill] sm:$0xff]  ;;  %v4143_v18 = vld [vmem:[#allocation29_spill] sm:$0xff] }
 0x3fd   : > { %v2044_v59 = vpop.f32.mrf.mxu0  ;;  %v2506_v1 = vmax.f32 %v2505_v42, %v4132_v28  ;;  %v2257_v19 = vpop.f32.mrf.mxu1 }
 0x3fe   : > { %v2474_v17 = vmax.f32 %v2473_v32, %v4129_v58  ;;  %v2421_v45 = vmax.f32 %v2420_v49, %v2042_v56  ;;  %v2452_v55 = vmax.f32 %v2451_v41, %v2044_v59  ;;  %v4135_v56 = vld [vmem:[#allocation21_spill] sm:$0xff]  ;;  %v4142_v32 = vld [vmem:[#allocation28_spill] sm:$0xff] }
 0x3ff   : > { %v2046_v4 = vpop.f32.mrf.mxu0  ;;  %v2507_v50 = vmax.f32 %v2506_v1, %v4134_v24  ;;  %v2259_v0 = vpop.f32.mrf.mxu1  ;;  %v4145_v24 = vld [vmem:[#allocation9_spill] sm:$0xff] }
 0x400   : > { %v2475_v22 = vmax.f32 %v2474_v17, %v4131_v44  ;;  %v2422_v35 = vmax.f32 %v2421_v45, %v2046_v4 }
 0x401   : > { %v2048_v5 = vpop.f32.mrf.mxu0  ;;  %v2508_v40 = vmax.f32 %v2507_v50, %v4136_v29  ;;  %v2261_v6 = vpop.f32.mrf.mxu1 }
 0x402   : > { %v2476_v39 = vmax.f32 %v2475_v22, %v4133_v14  ;;  %v2453_v16 = vmax.f32 %v2452_v55, %v2048_v5 }
 0x403   : > { %v2052_v20 = vpop.f32.mrf.mxu0  ;;  %v2509_v47 = vmax.f32 %v2508_v40, %v4138_v62  ;;  %v2265_v42 = vpop.f32.mrf.mxu1 }
 0x404   : > { %v2423_v38 = vmax.f32 %v2422_v35, %v2052_v20  ;;  %v2477_v54 = vmax.f32 %v2476_v39, %v4135_v56 }
 0x405   : > { %v2054_v43 = vpop.f32.mrf.mxu0  ;;  %v2510_v2 = vmax.f32 %v2509_v47, %v4140_v53 }
 0x406   : > { %v2454_v27 = vmax.f32 %v2453_v16, %v2054_v43  ;;  %v2478_v59 = vmax.f32 %v2477_v54, %v4137_v46  ;;  %v2267_v16 = vpop.f32.mrf.mxu1  ;;  %v4146_v46 = vld [vmem:[#allocation10_spill] sm:$0xff] }
 0x407   : > { %v2056_v33 = vpop.f32.mrf.mxu0 }
 0x408   : > { %v2424_v30 = vmax.f32 %v2423_v38, %v2056_v33  ;;  %v2479_v5 = vmax.f32 %v2478_v59, %v4139_v12  ;;  %v2511_v33 = vmax.f32 %v2510_v2, %v4142_v32  ;;  %v2269_v29 = vpop.f32.mrf.mxu1 }
 0x409   : > { %v2058_v61 = vpop.f32.mrf.mxu0 }
 0x40a   : > { %v2455_v48 = vmax.f32 %v2454_v27, %v2058_v61  ;;  %v2480_v34 = vmax.f32 %v2479_v5, %v4141_v3  ;;  %v4144_v61 = vld [vmem:[#allocation30_spill] sm:$0xff]  ;;  %v2629_v27 = vsub.s32 5, %v4145_v24  ;;  %v2271_v53 = vpop.f32.mrf.mxu1 }
 0x40b   : > { %v2062_v11 = vpop.f32.mrf.mxu0  ;;  %v2512_v41 = vmax.f32 %v2511_v33, %v4144_v61 }
 0x40c   : > { %v2425_v57 = vmax.f32 %v2424_v30, %v2062_v11  ;;  %v2481_v49 = vmax.f32 %v2480_v34, %v4143_v18  ;;  %v2630_v47 = vrot.slane %v4146_v46, %v2629_v27 }
 0x40d   : > { %v2064_v52 = vpop.f32.mrf.mxu0  ;;  %v2513_v11 = vmax.f32 %v2512_v41, %v3955_v7 }
 0x40e   : > { %v2456_v21 = vmax.f32 %v2455_v48, %v2064_v52  ;;  %v2482_v45 = vmax.f32 %v2481_v49, %v3953_v26  ;;  %v2625_v26 = vsub.s32 4, %v4145_v24 }
 0x40f   : > { %v2066_v51 = vpop.f32.mrf.mxu0  ;;  %v2514_v14 = vmax.f32 %v2513_v11, %v3964_v63  ;;  %v2633_v11 = vsub.s32 6, %v4145_v24 }
 0x410   : > { %v2426_v20 = vmax.f32 %v2425_v57, %v2066_v51  ;;  %v2483_v55 = vmax.f32 %v2482_v45, %v3957_v60  ;;  %v2626_v59 = vrot.slane %v4146_v46, %v2625_v26 }
 0x411   : > { %v2068_v4 = vpop.f32.mrf.mxu0  ;;  %v2515_v56 = vmax.f32 %v2514_v14, %v3976_v13 }
 0x412   : > { %v2457_v10 = vmax.f32 %v2456_v21, %v2068_v4  ;;  %v2484_v39 = vmax.f32 %v2483_v55, %v3970_v9  ;;  %v4147_v21 = vld [vmem:[#allocation11_spill] sm:$0xff] }
 0x413   : > { %v2072_v8 = vpop.f32.mrf.mxu0  ;;  %v2516_v30 = vmax.f32 %v2515_v56, %v3988_v15  ;;  %v2676_v15 = vrot.slane %v4147_v21, %v2625_v26  ;;  %v2684_v56 = vrot.slane %v4147_v21, %v2633_v11 }
 0x414   : > { %v2427_v31 = vmax.f32 %v2426_v20, %v2072_v8  ;;  %v2485_v54 = vmax.f32 %v2484_v39, %v3982_v25  ;;  %v2634_v39 = vrot.slane %v4146_v46, %v2633_v11 }
 0x415   : > { %v2074_v43 = vpop.f32.mrf.mxu0  ;;  %v2517_v48 = vmax.f32 %v2516_v30, %v2257_v19 }
 0x416   : > { %v2458_v58 = vmax.f32 %v2457_v10, %v2074_v43  ;;  %v2486_v63 = vmax.f32 %v2485_v54, %v3994_v36  ;;  %v2680_v36 = vrot.slane %v4147_v21, %v2629_v27  ;;  %v4148_v27 = vld [vmem:[#allocation12_spill] sm:$0xff] }
 0x417   : > { %v2076_v23 = vpop.f32.mrf.mxu0  ;;  %v2518_v5 = vmax.f32 %v2517_v48, %v2261_v6 }
 0x418   : > { %v2428_v17 = vmax.f32 %v2427_v31, %v2076_v23  ;;  %v2487_v57 = vmax.f32 %v2486_v63, %v2259_v0 }
 0x419   : > { %v2078_v37 = vpop.f32.mrf.mxu0  ;;  %v2519_v19 = vmax.f32 %v2518_v5, %v2267_v16 }
 0x41a   : > { %v2581_v44 = vrot.slane %v2428_v17, 4  ;;  %v2459_v22 = vmax.f32 %v2458_v58, %v2078_v37  ;;  %v2488_v8 = vmax.f32 %v2487_v57, %v2265_v42 }
 0x41b   : > { %v2115_v35 = vpop.f32.mrf.mxu0  ;;  %v2520_v18 = vmax.f32 %v2519_v19, %v2271_v53 }
 0x41c   : > { %v2582_v28 = vmax.f32 %v2428_v17, %v2581_v44  ;;  %v2587_v1 = vrot.slane %v2459_v22, 4  ;;  %v2489_v10 = vmax.f32 %v2488_v8, %v2269_v29  ;;  %v4149_v29 = vld [vmem:[#allocation13_spill] sm:$0xff] }
 0x41d   : > { %v2117_v52 = vpop.f32.mrf.mxu0 }
 0x41e   : > { %v2583_v38 = vrot.slane %v2582_v28, 2  ;;  %v2588_v50 = vmax.f32 %v2459_v22, %v2587_v1 }
 0x41f   : > { %v2119_v7 = vpop.f32.mrf.mxu0 }
 0x420   : > { %v2584_v51 = vmax.f32 %v2582_v28, %v2583_v38  ;;  %v2589_v60 = vrot.slane %v2588_v50, 2  ;;  %v2460_v12 = vmax.f32 %v2115_v35, %v2119_v7  ;;  %v2637_v28 = vsub.s32 7, %v4145_v24 }
 0x421   : > { %v2121_v9 = vpop.f32.mrf.mxu0 }
 0x422   : > { %v2585_v40 = vrot.slane %v2584_v51, 1  ;;  %v2590_v4 = vmax.f32 %v2588_v50, %v2589_v60  ;;  %v2491_v34 = vmax.f32 %v2117_v52, %v2121_v9  ;;  %v2638_v38 = vrot.slane %v4146_v46, %v2637_v28 }
 0x423   : > { %v2125_v13 = vpop.f32.mrf.mxu0  ;;  %v2688_v54 = vrot.slane %v4147_v21, %v2637_v28 }
 0x424   : > { %v2586_v62 = vmax.f32 %v2584_v51, %v2585_v40  ;;  %v2591_v25 = vrot.slane %v2590_v4, 1  ;;  %v2461_v43 = vmax.f32 %v2460_v12, %v2125_v13  ;;  %v4150_v40 = vld [vmem:[#allocation14_spill] sm:$0xff] }
 0x425   : > { %v2127_v20 = vpop.f32.mrf.mxu0  ;;  %v4151_v46 = vcombine.low %v4149_v29, %v4150_v40 }
 0x426   : > { %v2651_v2 = vmul.f32 %v2626_v59, %v2586_v62  ;;  %v2592_v3 = vmax.f32 %v2590_v4, %v2591_v25  ;;  %v2492_v32 = vmax.f32 %v2491_v34, %v2127_v20 }
 0x427   : > { %v2129_v0 = vpop.f32.mrf.mxu0  ;;  %v2753_v59 = vrot.slane %v4151_v46, %v4148_v27 }
 0x428   : > { %v2652_v31 = vmul.f32 %v2630_v47, %v2592_v3  ;;  %v2462_v33 = vmax.f32 %v2461_v43, %v2129_v0  ;;  %v2701_v6 = vadd.f32 %v2676_v15, %v2651_v2 }
 0x429   : > { %v2131_v49 = vpop.f32.mrf.mxu0 }
 0x42a   : > { %v2702_v23 = vadd.f32 %v2680_v36, %v2652_v31  ;;  %v2490_v58 = vmax.f32 %v2489_v10, %v2462_v33  ;;  %v2493_v17 = vmax.f32 %v2492_v32, %v2131_v49 }
 0x42c   : > { %v2715_v61 = vcombine.low %v2701_v6, %v2702_v23  ;;  %v2521_v41 = vmax.f32 %v2520_v18, %v2493_v17  ;;  %v2593_v45 = vrot.slane %v2490_v58, 4 }
 0x42e   : > { %v2594_v37 = vmax.f32 %v2490_v58, %v2593_v45  ;;  %v2599_v42 = vrot.slane %v2521_v41, 4  ;;  %v2737_v30 = vrot.slane %v2715_v61, %v4148_v27 }
 0x430   : > { %v2595_v44 = vrot.slane %v2594_v37, 2  ;;  %v2600_v22 = vmax.f32 %v2521_v41, %v2599_v42 }
 0x432   : > { %v2596_v55 = vmax.f32 %v2594_v37, %v2595_v44  ;;  %v2601_v35 = vrot.slane %v2600_v22, 2 }
 0x434   : > { %v2597_v1 = vrot.slane %v2596_v55, 1  ;;  %v2602_v14 = vmax.f32 %v2600_v22, %v2601_v35 }
 0x436   : > { %v2598_v52 = vmax.f32 %v2596_v55, %v2597_v1  ;;  %v2603_v16 = vrot.slane %v2602_v14, 1 }
 0x438   : > { %v2604_v26 = vmax.f32 %v2602_v14, %v2603_v16  ;;  %v2653_v50 = vmul.f32 %v2634_v39, %v2598_v52 }
 0x43a   : > { %v2654_v7 = vmul.f32 %v2638_v38, %v2604_v26  ;;  %v2703_v51 = vadd.f32 %v2684_v56, %v2653_v50 }
 0x43c   : > { %v2704_v60 = vadd.f32 %v2688_v54, %v2654_v7 }
 0x43e   : > { %v2716_v24 = vcombine.low %v2703_v51, %v2704_v60 }
 0x440   : > { %v2744_v63 = vrot.slane %v2716_v24, %v4148_v27 }
 0x442   : > { %v2746_v9 = vcombine.low %v2737_v30, %v2744_v63 }
 0x444   : > { %v2760_v4 = vrot.slane %v2746_v9, %v4148_v27 }
 0x446   : > { %v2761_v48 = vcombine.low %v2753_v59, %v2760_v4 }
 0x448   : > { %2763 = vst [vmem:[%s404_s12] sm:$0xff] %v2761_v48 }
 0x449   : > { %3181 = shalt.err (!%p3178_p3)
}
 0x44a   : > { %s3182_s1 = scalar_lea.hbm %s2779_s24, 128  ;;  %s3186_s12 = scalar_lea.hbm %s4088_s10, 256 }
 0x44b   : > { %p3183_p5 = scmp.ne.s32.totalorder %s2779_s24, %s3182_s1  ;;  %p3187_p9 = scmp.lt.s32.totalorder %s2779_s24, %s4088_s10 }
 0x44c   : > { %p3188_p12 = scmp.lt.s32.totalorder %s3186_s12, %s3182_s1 }
 0x44d   : > { %p3184_p6 = pnand %p3183_p5, %p3352_p4 }
 0x44e   : > { %p3189_p10 = por %p3188_p12, %p3187_p9 }
 0x44f   : > { %p3185_p7 = pneg %p3184_p6 }
 0x451   : > { %p3190_p11 = pnand %p3189_p10, %p3185_p7 }
 0x453   : > { %3193 = shalt.err (!%p3190_p11)
}
 0x454   : > { %3065 = dma.vmem_to_hbm [thread:$0]  (%p3352_p4), %s2782_s19, 128, %s2779_s24, %s2765_s29  }
 0x455 PF: > { %p3077_p13 = scmp.ge.s32.totalorder %s3248_s18, 2  ;;  %s2793_s0 = sand.u32 1, %s3228_s13  }
 0x456   : > { %s2794_s11 = scalar_lea.sflag [#allocation5], %s2793_s0 }
 0x457   : > { %p3072_p0 = pnand %p3077_p13, %p3359_p8 }
 0x459   : > { %p3073_p1 = pneg %p3072_p0 }
 0x45b   : > { %3223 = dma.done.wait (%p3073_p1), %s2794_s11, 128  }
 0x45c   : > { %3225 = vsyncadd (%p3073_p1), %s2794_s11, 4294967168  ;;  %s24_s18 = sadd.s32 1, %s3248_s18   ;;  %s4152_s13 = smov %s3232_s14 }
 0x45d   : > { %p21_p2 = scmp.ge.s32.totalorder %s24_s18, 4   ;;  %s4153_s14 = smov %s3236_s15 }
 0x45e   : > { %s4154_s15 = smov %s3365_s26  ;;  %s4155_s16 = smov %s3244_s17 }
 0x45f   : > { %s4156_s17 = smov %s4158_s21  ;;  %23 = sbr.rel (!%p21_p2) target bundleno = 8 (0x8), region = 108 }
 0x464   :  { %2799 = vsyncpa [#allocation4], 1 }
 0x465   :  { %2801 = vsyncpa [#allocation4 + $0x1], 1 }
 0x466   :  { %2802 = vsyncpa [#allocation5], 1 }
 0x467   :  { %2804 = vsyncpa [#allocation5 + $0x1], 1 }

</bundles_post_ra>
